<compile_context>
chip_gen: v7x
topology: tpu7x:2x2x1
jax: 0.10.0
libtpu: 0.0.40
codegen_flags: <defaults>
</compile_context>

<pallas_src>
import math
import functools

import jax
import jax.numpy as jnp
from jax import lax
from jax.experimental import pallas as pl
from jax.experimental.pallas import tpu as pltpu


# ----------------------------------------------------------------------------
# Pallas kernel: whole Block forward for one batch group (BB batch elements)
# ----------------------------------------------------------------------------
def _block_kernel(x_ref,
                  ln1_g_ref, ln1_b_ref,
                  w_qkv_ref, b_qkv_ref,
                  w_ap_ref, b_ap_ref,
                  ln2_g_ref, ln2_b_ref,
                  w_fc_ref, b_fc_ref,
                  w_mp_ref, b_mp_ref,
                  o_ref,
                  y_sc,
                  *, num_heads, compute_dtype, exp_dtype):
    BB, T, C = x_ref.shape
    H = num_heads
    D = C // H
    R = BB * T                          # rows presented to every matmul
    eps = 1e-5                          # PyTorch nn.LayerNorm default
    cdt = compute_dtype

    x = x_ref[...].reshape(R, C)        # (BB*T, C); T % 8 == 0 -> layout no-op

    def layer_norm(h, g_ref, b_ref):
        mu = jnp.mean(h, axis=-1, keepdims=True)
        var = jnp.mean((h - mu) ** 2, axis=-1, keepdims=True)
        return (h - mu) * lax.rsqrt(var + eps) * g_ref[0] + b_ref[0]

    # ---- attention branch ---------------------------------------------------
    h = layer_norm(x, ln1_g_ref, ln1_b_ref)
    qkv = jnp.dot(h.astype(cdt), w_qkv_ref[...],
                  preferred_element_type=jnp.float32) + b_qkv_ref[0]   # (R,3C) f32

    # additive causal bias, built once per grid step; broadcast by the add so it
    # is never materialized at (BB, T, T)
    row = lax.broadcasted_iota(jnp.int32, (T, T), 0)
    col = lax.broadcasted_iota(jnp.int32, (T, T), 1)
    mask_bias = jnp.where(row >= col, 0.0, -1e30).astype(jnp.float32)  # (T, T)

    scale = 1.0 / math.sqrt(D)
    for hh in range(H):                 # static loop over heads (see TODO above)
        q_h = qkv[:, 0 * C + hh * D: 0 * C + (hh + 1) * D].reshape(BB, T, D)
        k_h = qkv[:, 1 * C + hh * D: 1 * C + (hh + 1) * D].reshape(BB, T, D)
        v_h = qkv[:, 2 * C + hh * D: 2 * C + (hh + 1) * D].reshape(BB, T, D)

        # scores: contract D of both operands, batch over BB -> no k transpose
        s = lax.dot_general(q_h.astype(cdt), k_h.astype(cdt),
                            dimension_numbers=(((2,), (2,)), ((0,), (0,))),
                            preferred_element_type=jnp.float32) * scale  # (BB,T,T)
        s = s + mask_bias               # broadcast (T,T) -> (BB,T,T)

        # softmax: max/sum/normalize in f32; exp optionally bf16 (EUP) on v6e/v7x
        m = jnp.max(s, axis=-1, keepdims=True)
        e = jnp.exp((s - m).astype(exp_dtype))
        denom = jnp.sum(e.astype(jnp.float32), axis=-1, keepdims=True)
        p = (e * pl.reciprocal(denom, approx=True)).astype(cdt)

        o_h = lax.dot_general(p, v_h.astype(cdt),
                              dimension_numbers=(((2,), (1,)), ((0,), (0,))),
                              preferred_element_type=jnp.float32)        # (BB,T,D)

        # head output -> compute-dtype scratch at a static column slice (no concat)
        y_sc[:, hh * D:(hh + 1) * D] = o_h.reshape(R, D).astype(y_sc.dtype)

    y = jnp.dot(y_sc[...], w_ap_ref[...],
                preferred_element_type=jnp.float32) + b_ap_ref[0]
    x = x + y

    # ---- MLP branch ----------------------------------------------------------
    h = layer_norm(x, ln2_g_ref, ln2_b_ref)
    h = jnp.dot(h.astype(cdt), w_fc_ref[...],
                preferred_element_type=jnp.float32) + b_fc_ref[0]
    # GELU(approximate='tanh'), kept in f32
    h = 0.5 * h * (1.0 + jnp.tanh(math.sqrt(2.0 / math.pi) * (h + 0.044715 * h ** 3)))
    h = jnp.dot(h.astype(cdt), w_mp_ref[...],
                preferred_element_type=jnp.float32) + b_mp_ref[0]
    x = x + h

    o_ref[...] = x.reshape(BB, T, C).astype(o_ref.dtype)


# ----------------------------------------------------------------------------
# Per-generation knobs
# ----------------------------------------------------------------------------
def _device_kind():
    try:
        return jax.devices()[0].device_kind.lower()
    except Exception:
        return ""


def _vmem_limit_bytes(kind):
    mib = 1024 * 1024
    if "v7" in kind:
        return 52 * mib          # 64 MiB physical per TensorCore -> leave headroom
    if "v5" in kind or "v6" in kind:
        return 100 * mib         # 128 MiB physical; defaults are 16/32 MiB scoped
    return None                  # unknown part: leave the compiler default


def _target_rows(kind):
    return 256 if "v7" in kind else 512


def _pick_batch_group(B, T, target_rows, prefer_even_grid):
    """Largest divisor BB of B with BB*T <= target_rows (row folding of the
    batch dim).  On v7x prefer a BB that leaves an even grid so both
    TensorCores get work."""
    if T % 8 != 0:               # keep in-kernel reshapes layout-trivial
        return 1
    ok = [d for d in range(1, B + 1)
          if B % d == 0 and d * T <= max(target_rows, T)]
    if not ok:
        return 1
    if prefer_even_grid:
        even = [d for d in ok if (B // d) % 2 == 0]
        if even:
            return max(even)
    return max(ok)


# ----------------------------------------------------------------------------
# Wrapper
# ----------------------------------------------------------------------------
def gpt_block(x, params, num_heads, compute_dtype=jnp.float32):
    B, T, C = x.shape
    H4 = 4 * C
    kind = _device_kind()
    BB = _pick_batch_group(B, T, _target_rows(kind), prefer_even_grid="v7" in kind)
    grid = (B // BB,)

    # bf16 softmax-exp only where it pays (bf16 path, long T, bf16-EUP parts)
    is_bf16 = jnp.dtype(compute_dtype) == jnp.dtype(jnp.bfloat16)
    exp_dtype = (jnp.bfloat16
                 if (is_bf16 and T >= 512 and ("v6" in kind or "v7" in kind))
                 else jnp.float32)

    # Constant operands: whole-array, unblocked VMEM residency -> copied in once,
    # single-buffered, never re-fetched per grid step (intent of pl.Buffered(1)).
    wspec = pl.BlockSpec(memory_space=pltpu.MemorySpace.VMEM)

    in_specs = [pl.BlockSpec((BB, T, C), lambda b: (b, 0, 0))] + [wspec] * 12

    # Weights go to the MXU in compute_dtype (bf16 halves HBM traffic / VMEM and
    # doubles MXU throughput); biases / LN params stay f32, accumulation f32.
    wdt = compute_dtype
    weights = (params["ln1_g"], params["ln1_b"],
               params["w_qkv"].astype(wdt), params["b_qkv"],
               params["w_ap"].astype(wdt), params["b_ap"],
               params["ln2_g"], params["ln2_b"],
               params["w_fc"].astype(wdt), params["b_fc"],
               params["w_mp"].astype(wdt), params["b_mp"])

    kernel = functools.partial(_block_kernel, num_heads=num_heads,
                               compute_dtype=compute_dtype, exp_dtype=exp_dtype)

    cp_kwargs = dict(dimension_semantics=("parallel",))
    vmem_limit = _vmem_limit_bytes(kind)
    if vmem_limit is not None:
        cp_kwargs["vmem_limit_bytes"] = vmem_limit

    return pl.pallas_call(
        kernel,
        out_shape=jax.ShapeDtypeStruct((B, T, C), x.dtype),
        grid_spec=pltpu.PrefetchScalarGridSpec(
            num_scalar_prefetch=0,
            grid=grid,
            in_specs=in_specs,
            out_specs=pl.BlockSpec((BB, T, C), lambda b: (b, 0, 0)),
            scratch_shapes=[pltpu.VMEM((BB * T, C), compute_dtype)],
        ),
        compiler_params=pltpu.CompilerParams(**cp_kwargs),
    )(x, *weights)


# ----------------------------------------------------------------------------
# Pure-JAX reference (mirrors the PyTorch Block forward)
# ----------------------------------------------------------------------------
def reference_block(x, p, num_heads):
    B, T, C = x.shape
    D = C // num_heads

    def ln(h, g, b):
        mu = h.mean(-1, keepdims=True)
        var = ((h - mu) ** 2).mean(-1, keepdims=True)
        return (h - mu) / jnp.sqrt(var + 1e-5) * g[0] + b[0]

    h = ln(x, p["ln1_g"], p["ln1_b"])
    qkv = h @ p["w_qkv"] + p["b_qkv"][0]
    q, k, v = jnp.split(qkv, 3, axis=-1)
    q = q.reshape(B, T, num_heads, D).transpose(0, 2, 1, 3)
    k = k.reshape(B, T, num_heads, D).transpose(0, 2, 1, 3)
    v = v.reshape(B, T, num_heads, D).transpose(0, 2, 1, 3)
    att = (q @ jnp.swapaxes(k, -1, -2)) / math.sqrt(D)
    mask = jnp.tril(jnp.ones((T, T), bool))
    att = jnp.where(mask, att, -jnp.inf)
    att = jax.nn.softmax(att, axis=-1)
    y = (att @ v).transpose(0, 2, 1, 3).reshape(B, T, C)
    x = x + y @ p["w_ap"] + p["b_ap"][0]

    h = ln(x, p["ln2_g"], p["ln2_b"])
    h = h @ p["w_fc"] + p["b_fc"][0]
    h = 0.5 * h * (1.0 + jnp.tanh(math.sqrt(2.0 / math.pi) * (h + 0.044715 * h ** 3)))
    x = x + h @ p["w_mp"] + p["b_mp"][0]
    return x


# ----------------------------------------------------------------------------
# Main
# ----------------------------------------------------------------------------
if __name__ == "__main__":
    B, T, C, num_heads = 2, 8, 32, 4          # small GPT config: seq=8, embed=32
    H4 = 4 * C
    key = jax.random.PRNGKey(0)
    ks = jax.random.split(key, 12)

    params = {
        "ln1_g": jnp.ones((1, C), jnp.float32),
        "ln1_b": jax.random.normal(ks[0], (1, C), jnp.float32) * 0.02,
        "w_qkv": jax.random.normal(ks[1], (C, 3 * C), jnp.float32) * 0.02,
        "b_qkv": jax.random.normal(ks[2], (1, 3 * C), jnp.float32) * 0.02,
        "w_ap":  jax.random.normal(ks[3], (C, C), jnp.float32) * 0.02,
        "b_ap":  jax.random.normal(ks[4], (1, C), jnp.float32) * 0.02,
        "ln2_g": jnp.ones((1, C), jnp.float32),
        "ln2_b": jax.random.normal(ks[5], (1, C), jnp.float32) * 0.02,
        "w_fc":  jax.random.normal(ks[6], (C, H4), jnp.float32) * 0.02,
        "b_fc":  jax.random.normal(ks[7], (1, H4), jnp.float32) * 0.02,
        "w_mp":  jax.random.normal(ks[8], (H4, C), jnp.float32) * 0.02,
        "b_mp":  jax.random.normal(ks[9], (1, C), jnp.float32) * 0.02,
    }

    x = jax.random.normal(ks[10], (B, T, C), jnp.float32)

    ref = reference_block(x, params, num_heads)

    # f32 matmul path (tight check)
    out = gpt_block(x, params, num_heads, compute_dtype=jnp.float32)
    out = jax.block_until_ready(out)
    assert out.shape == (B, T, C)
    assert jnp.allclose(out, ref, atol=2e-3, rtol=2e-3), \
        float(jnp.max(jnp.abs(out - ref)))

    # bf16 matmul path with f32 accumulation (looser check)
    out_bf16 = gpt_block(x, params, num_heads, compute_dtype=jnp.bfloat16)
    out_bf16 = jax.block_until_ready(out_bf16)
    assert jnp.allclose(out_bf16, ref, atol=3e-2, rtol=3e-2), \
        float(jnp.max(jnp.abs(out_bf16 - ref)))

    print("KERNEL_OK")
</pallas_src>

<mosaic_0001>
module attributes {stable_mosaic.version = 11 : i64} {
  func.func @_block_kernel(%arg0: i32, %arg1: memref<2x8x32xf32, #tpu.memory_space<vmem>>, %arg2: memref<1x32xf32, #tpu.memory_space<vmem>>, %arg3: memref<1x32xf32, #tpu.memory_space<vmem>>, %arg4: memref<32x96xf32, #tpu.memory_space<vmem>>, %arg5: memref<1x96xf32, #tpu.memory_space<vmem>>, %arg6: memref<32x32xf32, #tpu.memory_space<vmem>>, %arg7: memref<1x32xf32, #tpu.memory_space<vmem>>, %arg8: memref<1x32xf32, #tpu.memory_space<vmem>>, %arg9: memref<1x32xf32, #tpu.memory_space<vmem>>, %arg10: memref<32x128xf32, #tpu.memory_space<vmem>>, %arg11: memref<1x128xf32, #tpu.memory_space<vmem>>, %arg12: memref<128x32xf32, #tpu.memory_space<vmem>>, %arg13: memref<1x32xf32, #tpu.memory_space<vmem>>, %arg14: memref<2x8x32xf32, #tpu.memory_space<vmem>>, %arg15: memref<16x32xf32, #tpu.memory_space<vmem>>) attributes {dimension_semantics = [#tpu.dimension_semantics<parallel>], iteration_bounds = array<i64: 1>, scalar_prefetch = 0 : i64, scratch_operands = 1 : i64, tpu.core_type = #tpu.core_type<tc>, window_params = [{transform_indices = @transform_0, window_bounds = array<i64: 2, 8, 32>}, {pipeline_mode = #tpu.pipeline_mode<synchronous>, transform_indices = @transform_1, window_bounds = array<i64: 1, 32>}, {pipeline_mode = #tpu.pipeline_mode<synchronous>, transform_indices = @transform_2, window_bounds = array<i64: 1, 32>}, {pipeline_mode = #tpu.pipeline_mode<synchronous>, transform_indices = @transform_3, window_bounds = array<i64: 32, 96>}, {pipeline_mode = #tpu.pipeline_mode<synchronous>, transform_indices = @transform_4, window_bounds = array<i64: 1, 96>}, {pipeline_mode = #tpu.pipeline_mode<synchronous>, transform_indices = @transform_5, window_bounds = array<i64: 32, 32>}, {pipeline_mode = #tpu.pipeline_mode<synchronous>, transform_indices = @transform_6, window_bounds = array<i64: 1, 32>}, {pipeline_mode = #tpu.pipeline_mode<synchronous>, transform_indices = @transform_7, window_bounds = array<i64: 1, 32>}, {pipeline_mode = #tpu.pipeline_mode<synchronous>, transform_indices = @transform_8, window_bounds = array<i64: 1, 32>}, {pipeline_mode = #tpu.pipeline_mode<synchronous>, transform_indices = @transform_9, window_bounds = array<i64: 32, 128>}, {pipeline_mode = #tpu.pipeline_mode<synchronous>, transform_indices = @transform_10, window_bounds = array<i64: 1, 128>}, {pipeline_mode = #tpu.pipeline_mode<synchronous>, transform_indices = @transform_11, window_bounds = array<i64: 128, 32>}, {pipeline_mode = #tpu.pipeline_mode<synchronous>, transform_indices = @transform_12, window_bounds = array<i64: 1, 32>}, {transform_indices = @transform_13, window_bounds = array<i64: 2, 8, 32>}]} {
    %c0 = arith.constant 0 : index
    %c0_0 = arith.constant 0 : index
    %c0_1 = arith.constant 0 : index
    %0 = vector.load %arg1[%c0, %c0_0, %c0_1] : memref<2x8x32xf32, #tpu.memory_space<vmem>>, vector<2x8x32xf32>
    %1 = vector.shape_cast %0 : vector<2x8x32xf32> to vector<16x32xf32>
    %cst = arith.constant dense<0.000000e+00> : vector<16xf32>
    %2 = vector.multi_reduction <add>, %1, %cst [1] : vector<16x32xf32> to vector<16xf32>
    %3 = vector.shape_cast %2 : vector<16xf32> to vector<16x1xf32>
    %cst_2 = arith.constant 3.200000e+01 : f32
    %4 = vector.broadcast %cst_2 : f32 to vector<16x1xf32>
    %5 = arith.divf %3, %4 : vector<16x1xf32>
    %6 = vector.broadcast %5 : vector<16x1xf32> to vector<16x32xf32>
    %7 = arith.subf %1, %6 : vector<16x32xf32>
    %8 = arith.mulf %7, %7 : vector<16x32xf32>
    %cst_3 = arith.constant dense<0.000000e+00> : vector<16xf32>
    %9 = vector.multi_reduction <add>, %8, %cst_3 [1] : vector<16x32xf32> to vector<16xf32>
    %10 = vector.shape_cast %9 : vector<16xf32> to vector<16x1xf32>
    %cst_4 = arith.constant 3.200000e+01 : f32
    %11 = vector.broadcast %cst_4 : f32 to vector<16x1xf32>
    %12 = arith.divf %10, %11 : vector<16x1xf32>
    %13 = vector.broadcast %5 : vector<16x1xf32> to vector<16x32xf32>
    %14 = arith.subf %1, %13 : vector<16x32xf32>
    %cst_5 = arith.constant 9.99999974E-6 : f32
    %15 = vector.broadcast %cst_5 : f32 to vector<16x1xf32>
    %16 = arith.addf %12, %15 : vector<16x1xf32>
    %17 = math.rsqrt %16 : vector<16x1xf32>
    %18 = vector.broadcast %17 : vector<16x1xf32> to vector<16x32xf32>
    %19 = arith.mulf %14, %18 : vector<16x32xf32>
    %c0_6 = arith.constant 0 : index
    %c0_7 = arith.constant 0 : index
    %20 = vector.load %arg2[%c0_6, %c0_7] : memref<1x32xf32, #tpu.memory_space<vmem>>, vector<1x32xf32>
    %21 = vector.shape_cast %20 : vector<1x32xf32> to vector<32xf32>
    %22 = vector.shape_cast %21 : vector<32xf32> to vector<1x32xf32>
    %23 = vector.broadcast %22 : vector<1x32xf32> to vector<16x32xf32>
    %24 = arith.mulf %19, %23 : vector<16x32xf32>
    %c0_8 = arith.constant 0 : index
    %c0_9 = arith.constant 0 : index
    %25 = vector.load %arg3[%c0_8, %c0_9] : memref<1x32xf32, #tpu.memory_space<vmem>>, vector<1x32xf32>
    %26 = vector.shape_cast %25 : vector<1x32xf32> to vector<32xf32>
    %27 = vector.shape_cast %26 : vector<32xf32> to vector<1x32xf32>
    %28 = vector.broadcast %27 : vector<1x32xf32> to vector<16x32xf32>
    %29 = arith.addf %24, %28 : vector<16x32xf32>
    %c0_10 = arith.constant 0 : index
    %c0_11 = arith.constant 0 : index
    %30 = vector.load %arg4[%c0_10, %c0_11] : memref<32x96xf32, #tpu.memory_space<vmem>>, vector<32x96xf32>
    %cst_12 = arith.constant dense<0.000000e+00> : vector<16x96xf32>
    %31 = tpu.matmul %29, %30, %cst_12 {dimension_numbers = #tpu.dot_dimension_numbers<[1], [0], [0], [1], [0, 0, 1, 1], [], []>} : vector<16x32xf32>, vector<32x96xf32>, vector<16x96xf32> -> vector<16x96xf32>
    %c0_13 = arith.constant 0 : index
    %c0_14 = arith.constant 0 : index
    %32 = vector.load %arg5[%c0_13, %c0_14] : memref<1x96xf32, #tpu.memory_space<vmem>>, vector<1x96xf32>
    %33 = vector.shape_cast %32 : vector<1x96xf32> to vector<96xf32>
    %34 = vector.shape_cast %33 : vector<96xf32> to vector<1x96xf32>
    %35 = vector.broadcast %34 : vector<1x96xf32> to vector<16x96xf32>
    %36 = arith.addf %31, %35 : vector<16x96xf32>
    %37 = tpu.iota {dimensions = array<i32: 0>} : vector<8x8xi32>
    %38 = tpu.iota {dimensions = array<i32: 1>} : vector<8x8xi32>
    %39 = arith.cmpi sge, %37, %38 : vector<8x8xi32>
    %cst_15 = arith.constant 0.000000e+00 : f32
    %cst_16 = arith.constant -1.000000e+30 : f32
    %40 = vector.broadcast %cst_15 : f32 to vector<8x8xf32>
    %41 = vector.broadcast %cst_16 : f32 to vector<8x8xf32>
    %42 = arith.select %39, %40, %41 : vector<8x8xi1>, vector<8x8xf32>
    %43 = vector.extract_strided_slice %36 {offsets = [0, 0], sizes = [16, 8], strides = [1, 1]} : vector<16x96xf32> to vector<16x8xf32>
    %44 = vector.shape_cast %43 : vector<16x8xf32> to vector<2x8x8xf32>
    %45 = vector.extract_strided_slice %36 {offsets = [0, 32], sizes = [16, 8], strides = [1, 1]} : vector<16x96xf32> to vector<16x8xf32>
    %46 = vector.shape_cast %45 : vector<16x8xf32> to vector<2x8x8xf32>
    %47 = vector.extract_strided_slice %36 {offsets = [0, 64], sizes = [16, 8], strides = [1, 1]} : vector<16x96xf32> to vector<16x8xf32>
    %48 = vector.shape_cast %47 : vector<16x8xf32> to vector<2x8x8xf32>
    %cst_17 = arith.constant dense<0.000000e+00> : vector<2x8x8xf32>
    %49 = tpu.matmul %44, %46, %cst_17 {dimension_numbers = #tpu.dot_dimension_numbers<[2], [2], [1], [1], [0, 0, 0, 1, 1, 1], [0], [0]>} : vector<2x8x8xf32>, vector<2x8x8xf32>, vector<2x8x8xf32> -> vector<2x8x8xf32>
    %cst_18 = arith.constant 0.353553385 : f32
    %50 = vector.broadcast %cst_18 : f32 to vector<2x8x8xf32>
    %51 = arith.mulf %49, %50 : vector<2x8x8xf32>
    %52 = vector.shape_cast %42 : vector<8x8xf32> to vector<1x8x8xf32>
    %53 = vector.broadcast %52 : vector<1x8x8xf32> to vector<2x8x8xf32>
    %54 = arith.addf %51, %53 : vector<2x8x8xf32>
    %cst_19 = arith.constant dense<0xFF800000> : vector<2x8xf32>
    %55 = vector.multi_reduction <maximumf>, %54, %cst_19 [2] : vector<2x8x8xf32> to vector<2x8xf32>
    %56 = vector.shape_cast %55 : vector<2x8xf32> to vector<2x8x1xf32>
    %57 = vector.broadcast %56 : vector<2x8x1xf32> to vector<2x8x8xf32>
    %58 = arith.subf %54, %57 : vector<2x8x8xf32>
    %59 = math.exp %58 : vector<2x8x8xf32>
    %cst_20 = arith.constant dense<0.000000e+00> : vector<2x8xf32>
    %60 = vector.multi_reduction <add>, %59, %cst_20 [2] : vector<2x8x8xf32> to vector<2x8xf32>
    %61 = vector.shape_cast %60 : vector<2x8xf32> to vector<2x8x1xf32>
    %62 = tpu.reciprocal %61 {approx = true} : vector<2x8x1xf32> -> vector<2x8x1xf32>
    %63 = vector.broadcast %62 : vector<2x8x1xf32> to vector<2x8x8xf32>
    %64 = arith.mulf %59, %63 : vector<2x8x8xf32>
    %cst_21 = arith.constant dense<0.000000e+00> : vector<2x8x8xf32>
    %65 = tpu.matmul %64, %48, %cst_21 {dimension_numbers = #tpu.dot_dimension_numbers<[2], [1], [1], [2], [0, 0, 0, 1, 1, 2], [0], [0]>} : vector<2x8x8xf32>, vector<2x8x8xf32>, vector<2x8x8xf32> -> vector<2x8x8xf32>
    %66 = vector.shape_cast %65 : vector<2x8x8xf32> to vector<16x8xf32>
    %c0_22 = arith.constant 0 : index
    %c0_23 = arith.constant 0 : index
    %67 = vector.load %arg15[%c0_22, %c0_23] : memref<16x32xf32, #tpu.memory_space<vmem>>, vector<16x8xf32>
    tpu.vector_store %arg15[%c0_22, %c0_23], %66 {strides = array<i32>} : memref<16x32xf32, #tpu.memory_space<vmem>>, vector<16x8xf32>,
    %68 = vector.extract_strided_slice %36 {offsets = [0, 8], sizes = [16, 8], strides = [1, 1]} : vector<16x96xf32> to vector<16x8xf32>
    %69 = vector.shape_cast %68 : vector<16x8xf32> to vector<2x8x8xf32>
    %70 = vector.extract_strided_slice %36 {offsets = [0, 40], sizes = [16, 8], strides = [1, 1]} : vector<16x96xf32> to vector<16x8xf32>
    %71 = vector.shape_cast %70 : vector<16x8xf32> to vector<2x8x8xf32>
    %72 = vector.extract_strided_slice %36 {offsets = [0, 72], sizes = [16, 8], strides = [1, 1]} : vector<16x96xf32> to vector<16x8xf32>
    %73 = vector.shape_cast %72 : vector<16x8xf32> to vector<2x8x8xf32>
    %cst_24 = arith.constant dense<0.000000e+00> : vector<2x8x8xf32>
    %74 = tpu.matmul %69, %71, %cst_24 {dimension_numbers = #tpu.dot_dimension_numbers<[2], [2], [1], [1], [0, 0, 0, 1, 1, 1], [0], [0]>} : vector<2x8x8xf32>, vector<2x8x8xf32>, vector<2x8x8xf32> -> vector<2x8x8xf32>
    %cst_25 = arith.constant 0.353553385 : f32
    %75 = vector.broadcast %cst_25 : f32 to vector<2x8x8xf32>
    %76 = arith.mulf %74, %75 : vector<2x8x8xf32>
    %77 = vector.shape_cast %42 : vector<8x8xf32> to vector<1x8x8xf32>
    %78 = vector.broadcast %77 : vector<1x8x8xf32> to vector<2x8x8xf32>
    %79 = arith.addf %76, %78 : vector<2x8x8xf32>
    %cst_26 = arith.constant dense<0xFF800000> : vector<2x8xf32>
    %80 = vector.multi_reduction <maximumf>, %79, %cst_26 [2] : vector<2x8x8xf32> to vector<2x8xf32>
    %81 = vector.shape_cast %80 : vector<2x8xf32> to vector<2x8x1xf32>
    %82 = vector.broadcast %81 : vector<2x8x1xf32> to vector<2x8x8xf32>
    %83 = arith.subf %79, %82 : vector<2x8x8xf32>
    %84 = math.exp %83 : vector<2x8x8xf32>
    %cst_27 = arith.constant dense<0.000000e+00> : vector<2x8xf32>
    %85 = vector.multi_reduction <add>, %84, %cst_27 [2] : vector<2x8x8xf32> to vector<2x8xf32>
    %86 = vector.shape_cast %85 : vector<2x8xf32> to vector<2x8x1xf32>
    %87 = tpu.reciprocal %86 {approx = true} : vector<2x8x1xf32> -> vector<2x8x1xf32>
    %88 = vector.broadcast %87 : vector<2x8x1xf32> to vector<2x8x8xf32>
    %89 = arith.mulf %84, %88 : vector<2x8x8xf32>
    %cst_28 = arith.constant dense<0.000000e+00> : vector<2x8x8xf32>
    %90 = tpu.matmul %89, %73, %cst_28 {dimension_numbers = #tpu.dot_dimension_numbers<[2], [1], [1], [2], [0, 0, 0, 1, 1, 2], [0], [0]>} : vector<2x8x8xf32>, vector<2x8x8xf32>, vector<2x8x8xf32> -> vector<2x8x8xf32>
    %91 = vector.shape_cast %90 : vector<2x8x8xf32> to vector<16x8xf32>
    %c0_29 = arith.constant 0 : index
    %c8 = arith.constant 8 : index
    %92 = vector.load %arg15[%c0_29, %c8] : memref<16x32xf32, #tpu.memory_space<vmem>>, vector<16x8xf32>
    tpu.vector_store %arg15[%c0_29, %c8], %91 {strides = array<i32>} : memref<16x32xf32, #tpu.memory_space<vmem>>, vector<16x8xf32>,
    %93 = vector.extract_strided_slice %36 {offsets = [0, 16], sizes = [16, 8], strides = [1, 1]} : vector<16x96xf32> to vector<16x8xf32>
    %94 = vector.shape_cast %93 : vector<16x8xf32> to vector<2x8x8xf32>
    %95 = vector.extract_strided_slice %36 {offsets = [0, 48], sizes = [16, 8], strides = [1, 1]} : vector<16x96xf32> to vector<16x8xf32>
    %96 = vector.shape_cast %95 : vector<16x8xf32> to vector<2x8x8xf32>
    %97 = vector.extract_strided_slice %36 {offsets = [0, 80], sizes = [16, 8], strides = [1, 1]} : vector<16x96xf32> to vector<16x8xf32>
    %98 = vector.shape_cast %97 : vector<16x8xf32> to vector<2x8x8xf32>
    %cst_30 = arith.constant dense<0.000000e+00> : vector<2x8x8xf32>
    %99 = tpu.matmul %94, %96, %cst_30 {dimension_numbers = #tpu.dot_dimension_numbers<[2], [2], [1], [1], [0, 0, 0, 1, 1, 1], [0], [0]>} : vector<2x8x8xf32>, vector<2x8x8xf32>, vector<2x8x8xf32> -> vector<2x8x8xf32>
    %cst_31 = arith.constant 0.353553385 : f32
    %100 = vector.broadcast %cst_31 : f32 to vector<2x8x8xf32>
    %101 = arith.mulf %99, %100 : vector<2x8x8xf32>
    %102 = vector.shape_cast %42 : vector<8x8xf32> to vector<1x8x8xf32>
    %103 = vector.broadcast %102 : vector<1x8x8xf32> to vector<2x8x8xf32>
    %104 = arith.addf %101, %103 : vector<2x8x8xf32>
    %cst_32 = arith.constant dense<0xFF800000> : vector<2x8xf32>
    %105 = vector.multi_reduction <maximumf>, %104, %cst_32 [2] : vector<2x8x8xf32> to vector<2x8xf32>
    %106 = vector.shape_cast %105 : vector<2x8xf32> to vector<2x8x1xf32>
    %107 = vector.broadcast %106 : vector<2x8x1xf32> to vector<2x8x8xf32>
    %108 = arith.subf %104, %107 : vector<2x8x8xf32>
    %109 = math.exp %108 : vector<2x8x8xf32>
    %cst_33 = arith.constant dense<0.000000e+00> : vector<2x8xf32>
    %110 = vector.multi_reduction <add>, %109, %cst_33 [2] : vector<2x8x8xf32> to vector<2x8xf32>
    %111 = vector.shape_cast %110 : vector<2x8xf32> to vector<2x8x1xf32>
    %112 = tpu.reciprocal %111 {approx = true} : vector<2x8x1xf32> -> vector<2x8x1xf32>
    %113 = vector.broadcast %112 : vector<2x8x1xf32> to vector<2x8x8xf32>
    %114 = arith.mulf %109, %113 : vector<2x8x8xf32>
    %cst_34 = arith.constant dense<0.000000e+00> : vector<2x8x8xf32>
    %115 = tpu.matmul %114, %98, %cst_34 {dimension_numbers = #tpu.dot_dimension_numbers<[2], [1], [1], [2], [0, 0, 0, 1, 1, 2], [0], [0]>} : vector<2x8x8xf32>, vector<2x8x8xf32>, vector<2x8x8xf32> -> vector<2x8x8xf32>
    %116 = vector.shape_cast %115 : vector<2x8x8xf32> to vector<16x8xf32>
    %c0_35 = arith.constant 0 : index
    %c16 = arith.constant 16 : index
    %117 = vector.load %arg15[%c0_35, %c16] : memref<16x32xf32, #tpu.memory_space<vmem>>, vector<16x8xf32>
    tpu.vector_store %arg15[%c0_35, %c16], %116 {strides = array<i32>} : memref<16x32xf32, #tpu.memory_space<vmem>>, vector<16x8xf32>,
    %118 = vector.extract_strided_slice %36 {offsets = [0, 24], sizes = [16, 8], strides = [1, 1]} : vector<16x96xf32> to vector<16x8xf32>
    %119 = vector.shape_cast %118 : vector<16x8xf32> to vector<2x8x8xf32>
    %120 = vector.extract_strided_slice %36 {offsets = [0, 56], sizes = [16, 8], strides = [1, 1]} : vector<16x96xf32> to vector<16x8xf32>
    %121 = vector.shape_cast %120 : vector<16x8xf32> to vector<2x8x8xf32>
    %122 = vector.extract_strided_slice %36 {offsets = [0, 88], sizes = [16, 8], strides = [1, 1]} : vector<16x96xf32> to vector<16x8xf32>
    %123 = vector.shape_cast %122 : vector<16x8xf32> to vector<2x8x8xf32>
    %cst_36 = arith.constant dense<0.000000e+00> : vector<2x8x8xf32>
    %124 = tpu.matmul %119, %121, %cst_36 {dimension_numbers = #tpu.dot_dimension_numbers<[2], [2], [1], [1], [0, 0, 0, 1, 1, 1], [0], [0]>} : vector<2x8x8xf32>, vector<2x8x8xf32>, vector<2x8x8xf32> -> vector<2x8x8xf32>
    %cst_37 = arith.constant 0.353553385 : f32
    %125 = vector.broadcast %cst_37 : f32 to vector<2x8x8xf32>
    %126 = arith.mulf %124, %125 : vector<2x8x8xf32>
    %127 = vector.shape_cast %42 : vector<8x8xf32> to vector<1x8x8xf32>
    %128 = vector.broadcast %127 : vector<1x8x8xf32> to vector<2x8x8xf32>
    %129 = arith.addf %126, %128 : vector<2x8x8xf32>
    %cst_38 = arith.constant dense<0xFF800000> : vector<2x8xf32>
    %130 = vector.multi_reduction <maximumf>, %129, %cst_38 [2] : vector<2x8x8xf32> to vector<2x8xf32>
    %131 = vector.shape_cast %130 : vector<2x8xf32> to vector<2x8x1xf32>
    %132 = vector.broadcast %131 : vector<2x8x1xf32> to vector<2x8x8xf32>
    %133 = arith.subf %129, %132 : vector<2x8x8xf32>
    %134 = math.exp %133 : vector<2x8x8xf32>
    %cst_39 = arith.constant dense<0.000000e+00> : vector<2x8xf32>
    %135 = vector.multi_reduction <add>, %134, %cst_39 [2] : vector<2x8x8xf32> to vector<2x8xf32>
    %136 = vector.shape_cast %135 : vector<2x8xf32> to vector<2x8x1xf32>
    %137 = tpu.reciprocal %136 {approx = true} : vector<2x8x1xf32> -> vector<2x8x1xf32>
    %138 = vector.broadcast %137 : vector<2x8x1xf32> to vector<2x8x8xf32>
    %139 = arith.mulf %134, %138 : vector<2x8x8xf32>
    %cst_40 = arith.constant dense<0.000000e+00> : vector<2x8x8xf32>
    %140 = tpu.matmul %139, %123, %cst_40 {dimension_numbers = #tpu.dot_dimension_numbers<[2], [1], [1], [2], [0, 0, 0, 1, 1, 2], [0], [0]>} : vector<2x8x8xf32>, vector<2x8x8xf32>, vector<2x8x8xf32> -> vector<2x8x8xf32>
    %141 = vector.shape_cast %140 : vector<2x8x8xf32> to vector<16x8xf32>
    %c0_41 = arith.constant 0 : index
    %c24 = arith.constant 24 : index
    %142 = vector.load %arg15[%c0_41, %c24] : memref<16x32xf32, #tpu.memory_space<vmem>>, vector<16x8xf32>
    tpu.vector_store %arg15[%c0_41, %c24], %141 {strides = array<i32>} : memref<16x32xf32, #tpu.memory_space<vmem>>, vector<16x8xf32>,
    %c0_42 = arith.constant 0 : index
    %c0_43 = arith.constant 0 : index
    %143 = vector.load %arg15[%c0_42, %c0_43] : memref<16x32xf32, #tpu.memory_space<vmem>>, vector<16x32xf32>
    %c0_44 = arith.constant 0 : index
    %c0_45 = arith.constant 0 : index
    %144 = vector.load %arg6[%c0_44, %c0_45] : memref<32x32xf32, #tpu.memory_space<vmem>>, vector<32x32xf32>
    %cst_46 = arith.constant dense<0.000000e+00> : vector<16x32xf32>
    %145 = tpu.matmul %143, %144, %cst_46 {dimension_numbers = #tpu.dot_dimension_numbers<[1], [0], [0], [1], [0, 0, 1, 1], [], []>} : vector<16x32xf32>, vector<32x32xf32>, vector<16x32xf32> -> vector<16x32xf32>
    %c0_47 = arith.constant 0 : index
    %c0_48 = arith.constant 0 : index
    %146 = vector.load %arg7[%c0_47, %c0_48] : memref<1x32xf32, #tpu.memory_space<vmem>>, vector<1x32xf32>
    %147 = vector.shape_cast %146 : vector<1x32xf32> to vector<32xf32>
    %148 = vector.shape_cast %147 : vector<32xf32> to vector<1x32xf32>
    %149 = vector.broadcast %148 : vector<1x32xf32> to vector<16x32xf32>
    %150 = arith.addf %145, %149 : vector<16x32xf32>
    %151 = arith.addf %1, %150 : vector<16x32xf32>
    %cst_49 = arith.constant dense<0.000000e+00> : vector<16xf32>
    %152 = vector.multi_reduction <add>, %151, %cst_49 [1] : vector<16x32xf32> to vector<16xf32>
    %153 = vector.shape_cast %152 : vector<16xf32> to vector<16x1xf32>
    %cst_50 = arith.constant 3.200000e+01 : f32
    %154 = vector.broadcast %cst_50 : f32 to vector<16x1xf32>
    %155 = arith.divf %153, %154 : vector<16x1xf32>
    %156 = vector.broadcast %155 : vector<16x1xf32> to vector<16x32xf32>
    %157 = arith.subf %151, %156 : vector<16x32xf32>
    %158 = arith.mulf %157, %157 : vector<16x32xf32>
    %cst_51 = arith.constant dense<0.000000e+00> : vector<16xf32>
    %159 = vector.multi_reduction <add>, %158, %cst_51 [1] : vector<16x32xf32> to vector<16xf32>
    %160 = vector.shape_cast %159 : vector<16xf32> to vector<16x1xf32>
    %cst_52 = arith.constant 3.200000e+01 : f32
    %161 = vector.broadcast %cst_52 : f32 to vector<16x1xf32>
    %162 = arith.divf %160, %161 : vector<16x1xf32>
    %163 = vector.broadcast %155 : vector<16x1xf32> to vector<16x32xf32>
    %164 = arith.subf %151, %163 : vector<16x32xf32>
    %cst_53 = arith.constant 9.99999974E-6 : f32
    %165 = vector.broadcast %cst_53 : f32 to vector<16x1xf32>
    %166 = arith.addf %162, %165 : vector<16x1xf32>
    %167 = math.rsqrt %166 : vector<16x1xf32>
    %168 = vector.broadcast %167 : vector<16x1xf32> to vector<16x32xf32>
    %169 = arith.mulf %164, %168 : vector<16x32xf32>
    %c0_54 = arith.constant 0 : index
    %c0_55 = arith.constant 0 : index
    %170 = vector.load %arg8[%c0_54, %c0_55] : memref<1x32xf32, #tpu.memory_space<vmem>>, vector<1x32xf32>
    %171 = vector.shape_cast %170 : vector<1x32xf32> to vector<32xf32>
    %172 = vector.shape_cast %171 : vector<32xf32> to vector<1x32xf32>
    %173 = vector.broadcast %172 : vector<1x32xf32> to vector<16x32xf32>
    %174 = arith.mulf %169, %173 : vector<16x32xf32>
    %c0_56 = arith.constant 0 : index
    %c0_57 = arith.constant 0 : index
    %175 = vector.load %arg9[%c0_56, %c0_57] : memref<1x32xf32, #tpu.memory_space<vmem>>, vector<1x32xf32>
    %176 = vector.shape_cast %175 : vector<1x32xf32> to vector<32xf32>
    %177 = vector.shape_cast %176 : vector<32xf32> to vector<1x32xf32>
    %178 = vector.broadcast %177 : vector<1x32xf32> to vector<16x32xf32>
    %179 = arith.addf %174, %178 : vector<16x32xf32>
    %c0_58 = arith.constant 0 : index
    %c0_59 = arith.constant 0 : index
    %180 = vector.load %arg10[%c0_58, %c0_59] : memref<32x128xf32, #tpu.memory_space<vmem>>, vector<32x128xf32>
    %cst_60 = arith.constant dense<0.000000e+00> : vector<16x128xf32>
    %181 = tpu.matmul %179, %180, %cst_60 {dimension_numbers = #tpu.dot_dimension_numbers<[1], [0], [0], [1], [0, 0, 1, 1], [], []>} : vector<16x32xf32>, vector<32x128xf32>, vector<16x128xf32> -> vector<16x128xf32>
    %c0_61 = arith.constant 0 : index
    %c0_62 = arith.constant 0 : index
    %182 = vector.load %arg11[%c0_61, %c0_62] : memref<1x128xf32, #tpu.memory_space<vmem>>, vector<1x128xf32>
    %183 = vector.shape_cast %182 : vector<1x128xf32> to vector<128xf32>
    %184 = vector.shape_cast %183 : vector<128xf32> to vector<1x128xf32>
    %185 = vector.broadcast %184 : vector<1x128xf32> to vector<16x128xf32>
    %186 = arith.addf %181, %185 : vector<16x128xf32>
    %cst_63 = arith.constant 5.000000e-01 : f32
    %187 = vector.broadcast %cst_63 : f32 to vector<16x128xf32>
    %188 = arith.mulf %187, %186 : vector<16x128xf32>
    %189 = arith.mulf %186, %186 : vector<16x128xf32>
    %190 = arith.mulf %186, %189 : vector<16x128xf32>
    %cst_64 = arith.constant 4.471500e-02 : f32
    %191 = vector.broadcast %cst_64 : f32 to vector<16x128xf32>
    %192 = arith.mulf %191, %190 : vector<16x128xf32>
    %193 = arith.addf %186, %192 : vector<16x128xf32>
    %cst_65 = arith.constant 0.797884583 : f32
    %194 = vector.broadcast %cst_65 : f32 to vector<16x128xf32>
    %195 = arith.mulf %194, %193 : vector<16x128xf32>
    %196 = math.tanh %195 : vector<16x128xf32>
    %cst_66 = arith.constant 1.000000e+00 : f32
    %197 = vector.broadcast %cst_66 : f32 to vector<16x128xf32>
    %198 = arith.addf %197, %196 : vector<16x128xf32>
    %199 = arith.mulf %188, %198 : vector<16x128xf32>
    %c0_67 = arith.constant 0 : index
    %c0_68 = arith.constant 0 : index
    %200 = vector.load %arg12[%c0_67, %c0_68] : memref<128x32xf32, #tpu.memory_space<vmem>>, vector<128x32xf32>
    %cst_69 = arith.constant dense<0.000000e+00> : vector<16x32xf32>
    %201 = tpu.matmul %199, %200, %cst_69 {dimension_numbers = #tpu.dot_dimension_numbers<[1], [0], [0], [1], [0, 0, 1, 1], [], []>} : vector<16x128xf32>, vector<128x32xf32>, vector<16x32xf32> -> vector<16x32xf32>
    %c0_70 = arith.constant 0 : index
    %c0_71 = arith.constant 0 : index
    %202 = vector.load %arg13[%c0_70, %c0_71] : memref<1x32xf32, #tpu.memory_space<vmem>>, vector<1x32xf32>
    %203 = vector.shape_cast %202 : vector<1x32xf32> to vector<32xf32>
    %204 = vector.shape_cast %203 : vector<32xf32> to vector<1x32xf32>
    %205 = vector.broadcast %204 : vector<1x32xf32> to vector<16x32xf32>
    %206 = arith.addf %201, %205 : vector<16x32xf32>
    %207 = arith.addf %151, %206 : vector<16x32xf32>
    %208 = vector.shape_cast %207 : vector<16x32xf32> to vector<2x8x32xf32>
    %c0_72 = arith.constant 0 : index
    %c0_73 = arith.constant 0 : index
    %c0_74 = arith.constant 0 : index
    %209 = vector.load %arg14[%c0_72, %c0_73, %c0_74] : memref<2x8x32xf32, #tpu.memory_space<vmem>>, vector<2x8x32xf32>
    tpu.vector_store %arg14[%c0_72, %c0_73, %c0_74], %208 {strides = array<i32>} : memref<2x8x32xf32, #tpu.memory_space<vmem>>, vector<2x8x32xf32>,
    return
  }
  func.func @transform_0(%arg0: i32) -> (i32, i32, i32) {
    %c0_i32 = arith.constant 0 : i32
    %c0_i32_0 = arith.constant 0 : i32
    %c0_i32_1 = arith.constant 0 : i32
    return %arg0, %c0_i32, %c0_i32_0 : i32, i32, i32
  }
  func.func @transform_1(%arg0: i32) -> (i32, i32) {
    %c0_i32 = arith.constant 0 : i32
    %c0_i32_0 = arith.constant 0 : i32
    %c0_i32_1 = arith.constant 0 : i32
    return %c0_i32, %c0_i32_0 : i32, i32
  }
  func.func @transform_2(%arg0: i32) -> (i32, i32) {
    %c0_i32 = arith.constant 0 : i32
    %c0_i32_0 = arith.constant 0 : i32
    %c0_i32_1 = arith.constant 0 : i32
    return %c0_i32, %c0_i32_0 : i32, i32
  }
  func.func @transform_3(%arg0: i32) -> (i32, i32) {
    %c0_i32 = arith.constant 0 : i32
    %c0_i32_0 = arith.constant 0 : i32
    %c0_i32_1 = arith.constant 0 : i32
    return %c0_i32, %c0_i32_0 : i32, i32
  }
  func.func @transform_4(%arg0: i32) -> (i32, i32) {
    %c0_i32 = arith.constant 0 : i32
    %c0_i32_0 = arith.constant 0 : i32
    %c0_i32_1 = arith.constant 0 : i32
    return %c0_i32, %c0_i32_0 : i32, i32
  }
  func.func @transform_5(%arg0: i32) -> (i32, i32) {
    %c0_i32 = arith.constant 0 : i32
    %c0_i32_0 = arith.constant 0 : i32
    %c0_i32_1 = arith.constant 0 : i32
    return %c0_i32, %c0_i32_0 : i32, i32
  }
  func.func @transform_6(%arg0: i32) -> (i32, i32) {
    %c0_i32 = arith.constant 0 : i32
    %c0_i32_0 = arith.constant 0 : i32
    %c0_i32_1 = arith.constant 0 : i32
    return %c0_i32, %c0_i32_0 : i32, i32
  }
  func.func @transform_7(%arg0: i32) -> (i32, i32) {
    %c0_i32 = arith.constant 0 : i32
    %c0_i32_0 = arith.constant 0 : i32
    %c0_i32_1 = arith.constant 0 : i32
    return %c0_i32, %c0_i32_0 : i32, i32
  }
  func.func @transform_8(%arg0: i32) -> (i32, i32) {
    %c0_i32 = arith.constant 0 : i32
    %c0_i32_0 = arith.constant 0 : i32
    %c0_i32_1 = arith.constant 0 : i32
    return %c0_i32, %c0_i32_0 : i32, i32
  }
  func.func @transform_9(%arg0: i32) -> (i32, i32) {
    %c0_i32 = arith.constant 0 : i32
    %c0_i32_0 = arith.constant 0 : i32
    %c0_i32_1 = arith.constant 0 : i32
    return %c0_i32, %c0_i32_0 : i32, i32
  }
  func.func @transform_10(%arg0: i32) -> (i32, i32) {
    %c0_i32 = arith.constant 0 : i32
    %c0_i32_0 = arith.constant 0 : i32
    %c0_i32_1 = arith.constant 0 : i32
    return %c0_i32, %c0_i32_0 : i32, i32
  }
  func.func @transform_11(%arg0: i32) -> (i32, i32) {
    %c0_i32 = arith.constant 0 : i32
    %c0_i32_0 = arith.constant 0 : i32
    %c0_i32_1 = arith.constant 0 : i32
    return %c0_i32, %c0_i32_0 : i32, i32
  }
  func.func @transform_12(%arg0: i32) -> (i32, i32) {
    %c0_i32 = arith.constant 0 : i32
    %c0_i32_0 = arith.constant 0 : i32
    %c0_i32_1 = arith.constant 0 : i32
    return %c0_i32, %c0_i32_0 : i32, i32
  }
  func.func @transform_13(%arg0: i32) -> (i32, i32, i32) {
    %c0_i32 = arith.constant 0 : i32
    %c0_i32_0 = arith.constant 0 : i32
    %c0_i32_1 = arith.constant 0 : i32
    return %arg0, %c0_i32, %c0_i32_0 : i32, i32, i32
  }
}

</mosaic_0001>

<bundles_post_ra>
// kernel: tpu_custom_call.1
= control target key start
LH: loop header
LB: loop body
LE: loop exit
PB: predicated region body
PF: predicated region fallthrough
CT: control target
= control target key end

     0   :  { %vm47_vm0 = vcmask 261120   ;;  %s2718_s0 = inlined_call_operand.vmem [shape: f32[2,8,32], index: 0, kind: input, shape index: {}]   ;;  %s2719_s1 = inlined_call_operand.vmem [shape: f32[1,32], index: 1, kind: input, shape index: {}]   ;;  %s2720_s2 = inlined_call_operand.vmem [shape: f32[1,32], index: 2, kind: input, shape index: {}]   ;;  %s2721_s3 = inlined_call_operand.vmem [shape: f32[32,96], index: 3, kind: input, shape index: {}]   ;;  %s2722_s4 = inlined_call_operand.vmem [shape: f32[1,96], index: 4, kind: input, shape index: {}]   ;;  %s2723_s5 = inlined_call_operand.vmem [shape: f32[32,32], index: 5, kind: input, shape index: {}]   ;;  %s2724_s6 = inlined_call_operand.vmem [shape: f32[1,32], index: 6, kind: input, shape index: {}]   ;;  %s2725_s7 = inlined_call_operand.vmem [shape: f32[1,32], index: 7, kind: input, shape index: {}]   ;;  %s2726_s8 = inlined_call_operand.vmem [shape: f32[1,32], index: 8, kind: input, shape index: {}]   ;;  %s2727_s9 = inlined_call_operand.vmem [shape: f32[32,128], index: 9, kind: input, shape index: {}]   ;;  %s2728_s10 = inlined_call_operand.vmem [shape: f32[1,128], index: 10, kind: input, shape index: {}]   ;;  %s2729_s11 = inlined_call_operand.vmem [shape: f32[128,32], index: 11, kind: input, shape index: {}]   ;;  %s2730_s12 = inlined_call_operand.vmem [shape: f32[1,32], index: 12, kind: input, shape index: {}]   ;;  %s2731_s13 = inlined_call_operand.hbm [shape: f32[2,8,32], index: 13, kind: output, shape index: {}]  }
   0x1   :  { %v2418_v0 = vld [vmem:[%s2718_s0] sm:$0xff]  ;;  %v2423_v1 = vld [vmem:[%s2718_s0 + $0x8] sm:$0xff] }
   0x2   :  { %18 = vsyncpa [#allocation4], 0  ;;  %v48_v2 = vsel %vm47_vm0, %v2418_v0, 0.0  ;;  %v51_v3 = vsel %vm47_vm0, %v2423_v1, 0.0  ;;  %v93_v14 = vld [vmem:[%s2721_s3] sm:$0xff]  ;;  %v94_v15 = vld [vmem:[%s2721_s3 + $0x8] sm:$0xff]  ;;  %v185_v44 = vlaneseq }
   0x3   :  { %49 = vadd.xlane.f32.xlu0 %v48_v2  ;;  %v95_v16 = vld [vmem:[%s2721_s3 + $0x10] sm:$0xff]  ;;  %v2183_v17 = vpack.c.bf16 %v94_v15, %v93_v14  ;;  %v96_v18 = vld [vmem:[%s2721_s3 + $0x18] sm:$0xff]  ;;  %v1929_v27 = vld [vmem:[%s2719_s1] ss:$0 sm:$0xff]  ;;  %v2326_v36 = vmov 0.0   ;;  %vm2327_vm1 = vmmov 0  }
   0x4   :  { %v2187_v19 = vpack.c.bf16 %v96_v18, %v95_v16  ;;  %v1930_v29 = vld [vmem:[%s2720_s2] ss:$0 sm:$0xff]  ;;  %2056 = vmatprep.subr.mxu0 %v2326_v36  ;;  %2058 = vmatprep.mubr.msk.f32.mxu0 %vm2327_vm1, %v2326_v36  ;;  %s2328_s22 = smov 96   ;;  %vm194_vm2 = vcmask 64512   ;;  %v186_v45 = vshrl.u32 %v185_v44, 7  ;;  %v188_v46 = vand.u32 127, %v185_v44 }
   0x5   :  { %2184 = vmatprep.subr.bf16.mxu1 %v2183_v17  ;;  %v1931_v37 = vld [vmem:[%s2722_s4] ss:$0 sm:$0xff]  ;;  %v2329_v48 = vmov -1e+30   ;;  %s2330_s4 = smov 64   ;;  %s2331_s23 = smov 88  }
   0x6   :  { %2186 = vmatpush3.bf16.msra.mxu1 %v2183_v17  ;;  %vm189_vm3 = vcmp.ge.s32.totalorder %v186_v45, %v188_v46  ;;  %s2332_s24 = smov 120   ;;  %s2333_s25 = smov 56   ;;  %vm868_vm4 = vcmask 130112   ;;  %vm1213_vm5 = vcmask 195712   ;;  %vm1558_vm6 = vcmask 261312  }
   0x7   :  { %52 = vadd.xlane.f32.xlu0 %v51_v3  ;;  %2188 = vmatprep.subr.bf16.mxu1 %v2187_v19  ;;  %v2480_v49 = vsel %vm189_vm3, 0.0, %v2329_v48  ;;  %s2334_s26 = smov 80   ;;  %s2335_s27 = smov 112  }
   0x8   :  { %s2336_s28 = smov 48   ;;  %s2337_s0 = smov 72  }
   0x9   :  { %s2338_s29 = smov 104   ;;  %s2339_s30 = smov 40  }
   0xa   :  { %2190 = vmatpush3.bf16.msra.mxu1 %v2187_v19  ;;  %s2340_s14 = smov 8   ;;  %s2341_s15 = smov 16  }
   0xb   :  { %2046 = vmatprep.subr.mxu1 %v2326_v36  ;;  %s2342_s2 = smov 24  }
  0x90   :  { %v50_v4 = vpop.xlane.xlu0 %49 }
  0x91   :  { %v55_v5 = vmul.f32 0.03125, %v50_v4 }
  0x93   :  { %v57_v6 = vsub.f32 %v2418_v0, %v55_v5 }
  0x94   :  { %v53_v7 = vpop.xlane.xlu0 %52 }
  0x95   :  { %v56_v8 = vmul.f32 0.03125, %v53_v7  ;;  %v59_v9 = vmul.f32 %v57_v6, %v57_v6 }
  0x97   :  { %v58_v10 = vsub.f32 %v2423_v1, %v56_v8  ;;  %v61_v11 = vsel %vm47_vm0, %v59_v9, 0.0 }
  0x98   :  { %62 = vadd.xlane.f32.xlu1 %v61_v11 }
  0x99   :  { %v60_v12 = vmul.f32 %v58_v10, %v58_v10 }
  0x9b   :  { %v64_v13 = vsel %vm47_vm0, %v60_v12, 0.0 }
  0x9c   :  { %65 = vadd.xlane.f32.xlu1 %v64_v13 }
 0x125   :  { %v63_v20 = vpop.xlane.xlu1 %62 }
 0x126   :  { %v67_v21 = vmul.f32 0.03125, %v63_v20 }
 0x128   :  { %v69_v22 = vadd.f32 1e-05, %v67_v21 }
 0x129   :  { %v66_v23 = vpop.xlane.xlu1 %65 }
 0x12a   :  { %2258 = vrsqrt.f32 %v69_v22  ;;  %v68_v24 = vmul.f32 0.03125, %v66_v23 }
 0x12c   :  { %v70_v25 = vadd.f32 1e-05, %v68_v24 }
 0x12e   :  { %2260 = vrsqrt.f32 %v70_v25 }
 0x134   :  { %v2259_v26 = vpop.eup %2258 }
 0x135   :  { %v73_v28 = vmul.f32 %v2259_v26, %v57_v6 }
 0x137   :  { %v82_v30 = vmul.f32 %v1929_v27, %v73_v28 }
 0x138   :  { %v2261_v31 = vpop.eup %2260 }
 0x139   :  { %v74_v32 = vmul.f32 %v2261_v31, %v58_v10  ;;  %v91_v33 = vadd.f32 %v1930_v29, %v82_v30 }
 0x13b   :  { %v83_v34 = vmul.f32 %v1929_v27, %v74_v32  ;;  %2043 = vmatprep.mubr.msk.f32.mxu1 %vm47_vm0, %v91_v33 }
 0x13d   :  { %v92_v35 = vadd.f32 %v1930_v29, %v83_v34 }
 0x13f   :  { %2044 = vmatmul.mubr.msk.f32.vlgmr.msra.gmra.mrb[0].mxu1 %vm47_vm0, %v92_v35 }
 0x140   :  { %2048 = vmatprep.mubr.msk.f32.mxu1 %vm2327_vm1, %v2326_v36 }
 0x212   :  { %v2045_v38 = vpop.f32.mrb[0].mxu1 }
 0x213   :  { %v2462_v39 = vadd.f32 %v2045_v38, %v1931_v37  ;;  %v176_v40 = vpop.f32.mrb[1].mxu1 }
 0x214   :  { %v2464_v41 = vadd.f32 %v1931_v37, %v176_v40 }
 0x215   :  { %270 = vrot.lane.b32.xlu1 %v2462_v39, %s2328_s22 }
 0x216   :  { %192 = vrot.lane.b32.xlu0 %v2464_v41, %s2328_s22 }
 0x287   :  { %v271_v43 = vpop.permute.xlu1 %270 }
 0x288   :  { %v193_v42 = vpop.permute.xlu0 %192 }
 0x289   :  { %2047 = vmatpush3.xpose.msk.msra.mxu1 %vm194_vm2, %v193_v42 }
 0x28a   :  { %2051 = vmatprep.subr.mxu1 %v2326_v36 }
 0x28c   :  { %2049 = vmatmul.mubr.msk.f32.vlgmr.msra.gmra.mrb[2].mxu1 %vm194_vm2, %v2464_v41 }
 0x28d   :  { %2052 = vmatpush3.xpose.msk.msra.mxu1 %vm194_vm2, %v271_v43  ;;  %2053 = vmatprep.mubr.msk.f32.mxu1 %vm2327_vm1, %v2326_v36 }
 0x28e   :  { %2061 = vmatprep.subr.mxu1 %v2326_v36 }
 0x290   :  { %2054 = vmatmul.mubr.msk.f32.vlgmr.msra.gmra.mrb[4].mxu1 %vm194_vm2, %v2462_v39 }
 0x291   :  { %2063 = vmatprep.mubr.msk.f32.mxu1 %vm2327_vm1, %v2326_v36 }
 0x35f   :  { %v265_v47 = vpop.f32.mrb[2].mxu1 }
 0x360   :  { %v346_v50 = vmul.f32 0.35355338, %v265_v47  ;;  %v2050_v51 = vpop.f32.mrb[3].mxu1 }
 0x362   :  { %v348_v52 = vadd.f32 %v346_v50, %v2480_v49 }
 0x363   :  { %v342_v53 = vpop.f32.mrb[4].mxu1 }
 0x364   :  { %v347_v54 = vmul.f32 0.35355338, %v342_v53  ;;  %v2055_v55 = vpop.f32.mrb[5].mxu1  ;;  %v350_v56 = vsel %vm194_vm2, %v348_v52, -inf }
 0x365   :  { %351 = vmax.xlane.f32.xlu1 %v350_v56 }
 0x366   :  { %v349_v57 = vadd.f32 %v347_v54, %v2480_v49 }
 0x368   :  { %v353_v58 = vsel %vm194_vm2, %v349_v57, -inf }
 0x369   :  { %354 = vmax.xlane.f32.xlu0 %v353_v58 }
 0x376   :  { %448 = vrot.lane.b32.xlu1 %v2462_v39, %s2330_s4 }
 0x37a   :  { %528 = vrot.lane.b32.xlu1 %v2464_v41, %s2331_s23 }
 0x37e   :  { %606 = vrot.lane.b32.xlu1 %v2462_v39, %s2331_s23 }
 0x37f   :  { %372 = vrot.lane.b32.xlu0 %v2464_v41, %s2330_s4 }
 0x3f2   :  { %v352_v59 = vpop.xlane.xlu1 %351 }
 0x3f3   :  { %v356_v60 = vsub.f32 %v348_v52, %v352_v59 }
 0x3f5   :  { %v358_v61 = vmul.f32 1.442695, %v356_v60 }
 0x3f6   :  { %v449_v62 = vpop.permute.xlu1 %448  ;;  %v355_v63 = vpop.xlane.xlu0 %354 }
 0x3f7   :  { %2262 = vpow2.f32 %v358_v61  ;;  %v357_v2 = vsub.f32 %v349_v57, %v355_v63  ;;  %2062 = vmatpush3.msra.mxu1 %v449_v62 }
 0x3f8   :  { %2071 = vmatprep.subr.mxu1 %v2326_v36 }
 0x3f9   :  { %v360_v3 = vmul.f32 1.442695, %v357_v2 }
 0x3fa   :  { %v373_v4 = vpop.permute.xlu0 %372  ;;  %v529_v9 = vpop.permute.xlu1 %528 }
 0x3fb   :  { %2264 = vpow2.f32 %v360_v3  ;;  %2057 = vmatpush3.msra.mxu0 %v373_v4 }
 0x3fc   :  { %2066 = vmatprep.subr.mxu0 %v2326_v36 }
 0x3fe   :  { %v607_v10 = vpop.permute.xlu1 %606 }
 0x401   :  { %v2263_v5 = vpop.eup %2262 }
 0x402   :  { %v362_v6 = vsel %vm194_vm2, %v2263_v5, 0.0 }
 0x403   :  { %363 = vadd.xlane.f32.xlu0 %v362_v6 }
 0x405   :  { %v2265_v7 = vpop.eup %2264 }
 0x406   :  { %v365_v8 = vsel %vm194_vm2, %v2265_v7, 0.0 }
 0x407   :  { %366 = vadd.xlane.f32.xlu1 %v365_v8 }
 0x418   :  { %604 = vrot.lane.b32.xlu1 %v2462_v39, %s2332_s24 }
 0x419   :  { %526 = vrot.lane.b32.xlu0 %v2464_v41, %s2332_s24 }
 0x490   :  { %v364_v11 = vpop.xlane.xlu0 %363 }
 0x491   :  { %2266 = vrcp.f32 %v364_v11 }
 0x494   :  { %v367_v12 = vpop.xlane.xlu1 %366  ;;  %v527_v17 = vpop.permute.xlu0 %526 }
 0x495   :  { %2268 = vrcp.f32 %v367_v12 }
 0x498   :  { %v605_v18 = vpop.permute.xlu1 %604 }
 0x49b   :  { %v2267_v13 = vpop.eup %2266 }
 0x49c   :  { %v370_v14 = vmul.f32 %v2267_v13, %v2263_v5 }
 0x49e   :  { %2059 = vmatmul.mubr.msk.f32.vlgmr.msra.gmra.mrb[0].mxu0 %vm194_vm2, %v370_v14 }
 0x49f   :  { %v2269_v15 = vpop.eup %2268  ;;  %2067 = vmatpush3.xpose.msk.msra.mxu0 %vm194_vm2, %v529_v9  ;;  %2068 = vmatprep.mubr.msk.f32.mxu0 %vm2327_vm1, %v2326_v36 }
 0x4a0   :  { %v371_v16 = vmul.f32 %v2269_v15, %v2265_v7  ;;  %2076 = vmatprep.subr.mxu0 %v2326_v36 }
 0x4a2   :  { %2064 = vmatmul.mubr.msk.f32.vlgmr.msra.gmra.mrb[6].mxu1 %vm194_vm2, %v371_v16  ;;  %2069 = vmatmul.mubr.msk.f32.vlgmr.msra.gmra.mrb[2].mxu0 %vm194_vm2, %v527_v17 }
 0x4a3   :  { %2072 = vmatpush3.xpose.msk.msra.mxu1 %vm194_vm2, %v607_v10  ;;  %2073 = vmatprep.mubr.msk.f32.mxu1 %vm2327_vm1, %v2326_v36 }
 0x4a4   :  { %2081 = vmatprep.subr.mxu1 %v2326_v36  ;;  %2078 = vmatprep.mubr.msk.f32.mxu0 %vm2327_vm1, %v2326_v36 }
 0x4a6   :  { %2074 = vmatmul.mubr.msk.f32.vlgmr.msra.gmra.mrb[8].mxu1 %vm194_vm2, %v605_v18 }
 0x4a7   :  { %2083 = vmatprep.mubr.msk.f32.mxu1 %vm2327_vm1, %v2326_v36 }
 0x571   :  { %v444_v19 = vpop.f32.mrb[0].mxu0 }
 0x572   :  { %524 = vst.msk [vmem:[#allocation2] sm:$0xff] %vm194_vm2, %v444_v19  ;;  %v2060_v20 = vpop.f32.mrb[1].mxu0 }
 0x575   :  { %v520_v21 = vpop.f32.mrb[6].mxu1  ;;  %v600_v22 = vpop.f32.mrb[2].mxu0 }
 0x576   :  { %525 = vst.msk [vmem:[#allocation2 + $0x8] sm:$0xff] %vm194_vm2, %v520_v21  ;;  %v682_v23 = vmul.f32 0.35355338, %v600_v22  ;;  %v2065_v24 = vpop.f32.mrb[7].mxu1  ;;  %v2070_v25 = vpop.f32.mrb[3].mxu0 }
 0x578   :  { %v684_v26 = vadd.f32 %v682_v23, %v2480_v49 }
 0x579   :  { %v678_v27 = vpop.f32.mrb[8].mxu1 }
 0x57a   :  { %v683_v28 = vmul.f32 0.35355338, %v678_v27  ;;  %v2075_v29 = vpop.f32.mrb[9].mxu1  ;;  %v686_v30 = vsel %vm194_vm2, %v684_v26, -inf }
 0x57b   :  { %687 = vmax.xlane.f32.xlu0 %v686_v30 }
 0x57c   :  { %v685_v31 = vadd.f32 %v683_v28, %v2480_v49 }
 0x57e   :  { %v689_v32 = vsel %vm194_vm2, %v685_v31, -inf }
 0x57f   :  { %690 = vmax.xlane.f32.xlu1 %v689_v32 }
 0x590   :  { %784 = vrot.lane.b32.xlu1 %v2462_v39, %s2333_s25 }
 0x591   :  { %708 = vrot.lane.b32.xlu0 %v2464_v41, %s2333_s25 }
 0x594   :  { %873 = vrot.lane.b32.xlu1 %v2464_v41, %s2334_s26 }
 0x598   :  { %951 = vrot.lane.b32.xlu1 %v2462_v39, %s2334_s26 }
 0x59c   :  { %949 = vrot.lane.b32.xlu1 %v2462_v39, %s2335_s27 }
 0x608   :  { %v688_v33 = vpop.xlane.xlu0 %687 }
 0x609   :  { %v692_v34 = vsub.f32 %v684_v26, %v688_v33 }
 0x60b   :  { %v694_v35 = vmul.f32 1.442695, %v692_v34 }
 0x60c   :  { %v709_v37 = vpop.permute.xlu0 %708  ;;  %v691_v38 = vpop.xlane.xlu1 %690 }
 0x60d   :  { %2270 = vpow2.f32 %v694_v35  ;;  %v693_v40 = vsub.f32 %v685_v31, %v691_v38  ;;  %2077 = vmatpush3.msra.mxu0 %v709_v37 }
 0x60e   :  { %2086 = vmatprep.subr.mxu0 %v2326_v36 }
 0x60f   :  { %v696_v42 = vmul.f32 1.442695, %v693_v40 }
 0x610   :  { %v785_v43 = vpop.permute.xlu1 %784 }
 0x611   :  { %2272 = vpow2.f32 %v696_v42  ;;  %2082 = vmatpush3.msra.mxu1 %v785_v43 }
 0x612   :  { %2091 = vmatprep.subr.mxu1 %v2326_v36 }
 0x614   :  { %v874_v51 = vpop.permute.xlu1 %873 }
 0x617   :  { %v2271_v44 = vpop.eup %2270 }
 0x618   :  { %v698_v45 = vsel %vm194_vm2, %v2271_v44, 0.0  ;;  %v952_v55 = vpop.permute.xlu1 %951 }
 0x619   :  { %699 = vadd.xlane.f32.xlu0 %v698_v45 }
 0x61b   :  { %v2273_v46 = vpop.eup %2272 }
 0x61c   :  { %v701_v47 = vsel %vm194_vm2, %v2273_v46, 0.0  ;;  %v950_v58 = vpop.permute.xlu1 %949 }
 0x61d   :  { %702 = vadd.xlane.f32.xlu0 %v701_v47 }
 0x633   :  { %871 = vrot.lane.b32.xlu0 %v2464_v41, %s2335_s27 }
 0x6a6   :  { %v700_v48 = vpop.xlane.xlu0 %699 }
 0x6a7   :  { %2274 = vrcp.f32 %v700_v48 }
 0x6aa   :  { %v703_v50 = vpop.xlane.xlu0 %702 }
 0x6ab   :  { %2276 = vrcp.f32 %v703_v50 }
 0x6ae   :  { %v872_v57 = vpop.permute.xlu0 %871 }
 0x6b1   :  { %v2275_v52 = vpop.eup %2274 }
 0x6b2   :  { %v706_v53 = vmul.f32 %v2275_v52, %v2271_v44 }
 0x6b4   :  { %2079 = vmatmul.mubr.msk.f32.vlgmr.msra.gmra.mrb[4].mxu0 %vm194_vm2, %v706_v53 }
 0x6b5   :  { %v2277_v54 = vpop.eup %2276  ;;  %2087 = vmatpush3.xpose.msk.msra.mxu0 %vm194_vm2, %v874_v51  ;;  %2088 = vmatprep.mubr.msk.f32.mxu0 %vm2327_vm1, %v2326_v36 }
 0x6b6   :  { %v707_v56 = vmul.f32 %v2277_v54, %v2273_v46  ;;  %2096 = vmatprep.subr.mxu0 %v2326_v36 }
 0x6b8   :  { %2084 = vmatmul.mubr.msk.f32.vlgmr.msra.gmra.mrb[10].mxu1 %vm194_vm2, %v707_v56  ;;  %2089 = vmatmul.mubr.msk.f32.vlgmr.msra.gmra.mrb[6].mxu0 %vm194_vm2, %v872_v57 }
 0x6b9   :  { %2092 = vmatpush3.xpose.msk.msra.mxu1 %vm194_vm2, %v952_v55  ;;  %2093 = vmatprep.mubr.msk.f32.mxu1 %vm2327_vm1, %v2326_v36 }
 0x6ba   :  { %2101 = vmatprep.subr.mxu1 %v2326_v36  ;;  %2098 = vmatprep.mubr.msk.f32.mxu0 %vm2327_vm1, %v2326_v36 }
 0x6bc   :  { %2094 = vmatmul.mubr.msk.f32.vlgmr.msra.gmra.mrb[12].mxu1 %vm194_vm2, %v950_v58 }
 0x6bd   :  { %2103 = vmatprep.mubr.msk.f32.mxu1 %vm2327_vm1, %v2326_v36 }
 0x787   :  { %v2544_v59 = vpop.f32.mrb[4].mxu0 }
 0x788   :  { %v2080_v60 = vpop.f32.mrb[5].mxu0 }
 0x78b   :  { %v2546_v61 = vpop.f32.mrb[10].mxu1  ;;  %v945_v62 = vpop.f32.mrb[6].mxu0 }
 0x78c   :  { %v1027_v63 = vmul.f32 0.35355338, %v945_v62  ;;  %v2085_v2 = vpop.f32.mrb[11].mxu1  ;;  %v2090_v3 = vpop.f32.mrb[7].mxu0 }
 0x78e   :  { %v1029_v4 = vadd.f32 %v1027_v63, %v2480_v49 }
 0x78f   :  { %v1023_v5 = vpop.f32.mrb[12].mxu1 }
 0x790   :  { %v1028_v6 = vmul.f32 0.35355338, %v1023_v5  ;;  %v2095_v7 = vpop.f32.mrb[13].mxu1  ;;  %v1031_v8 = vsel %vm194_vm2, %v1029_v4, -inf }
 0x791   :  { %1032 = vmax.xlane.f32.xlu0 %v1031_v8  ;;  %v1564_v8 = vld [vmem:[%s2723_s5 + $0x8] sm:$0xff] }
 0x792   :  { %v1030_v9 = vadd.f32 %v1028_v6, %v2480_v49 }
 0x794   :  { %v1034_v10 = vsel %vm194_vm2, %v1030_v9, -inf }
 0x795   :  { %1035 = vmax.xlane.f32.xlu1 %v1034_v10  ;;  %v1565_v10 = vld [vmem:[%s2723_s5 + $0x10] sm:$0xff] }
 0x7a6   :  { %1129 = vrot.lane.b32.xlu1 %v2462_v39, %s2336_s28 }
 0x7a7   :  { %1053 = vrot.lane.b32.xlu0 %v2464_v41, %s2336_s28 }
 0x7aa   :  { %1218 = vrot.lane.b32.xlu1 %v2464_v41, %s2337_s0 }
 0x7ae   :  { %1296 = vrot.lane.b32.xlu1 %v2462_v39, %s2337_s0 }
 0x7b2   :  { %1294 = vrot.lane.b32.xlu1 %v2462_v39, %s2338_s29 }
 0x81e   :  { %v1033_v11 = vpop.xlane.xlu0 %1032 }
 0x81f   :  { %v1037_v12 = vsub.f32 %v1029_v4, %v1033_v11  ;;  %v1566_v11 = vld [vmem:[%s2723_s5 + $0x18] sm:$0xff] }
 0x821   :  { %v1039_v13 = vmul.f32 1.442695, %v1037_v12  ;;  %v2195_v12 = vpack.c.bf16 %v1566_v11, %v1565_v10  ;;  %v1819_v10 = vld [vmem:[%s2729_s11 + $0x40] sm:$0xff]  ;;  %v1820_v11 = vld [vmem:[%s2729_s11 + $0x48] sm:$0xff] }
 0x822   :  { %v1054_v14 = vpop.permute.xlu0 %1053  ;;  %v1036_v15 = vpop.xlane.xlu1 %1035 }
 0x823   :  { %2278 = vpow2.f32 %v1039_v13  ;;  %v1038_v16 = vsub.f32 %v1030_v9, %v1036_v15  ;;  %2097 = vmatpush3.msra.mxu0 %v1054_v14 }
 0x824   :  { %2106 = vmatprep.subr.mxu0 %v2326_v36 }
 0x825   :  { %v1041_v17 = vmul.f32 1.442695, %v1038_v16 }
 0x826   :  { %v1130_v18 = vpop.permute.xlu1 %1129 }
 0x827   :  { %2280 = vpow2.f32 %v1041_v17  ;;  %2102 = vmatpush3.msra.mxu1 %v1130_v18 }
 0x828   :  { %2111 = vmatprep.subr.mxu1 %v2326_v36 }
 0x82a   :  { %v1219_v25 = vpop.permute.xlu1 %1218 }
 0x82d   :  { %v2279_v19 = vpop.eup %2278 }
 0x82e   :  { %v1043_v20 = vsel %vm194_vm2, %v2279_v19, 0.0  ;;  %v1297_v29 = vpop.permute.xlu1 %1296 }
 0x82f   :  { %1044 = vadd.xlane.f32.xlu0 %v1043_v20 }
 0x831   :  { %v2281_v21 = vpop.eup %2280 }
 0x832   :  { %v1046_v22 = vsel %vm194_vm2, %v2281_v21, 0.0  ;;  %v1295_v32 = vpop.permute.xlu1 %1294 }
 0x833   :  { %1047 = vadd.xlane.f32.xlu0 %v1046_v22 }
 0x849   :  { %1216 = vrot.lane.b32.xlu0 %v2464_v41, %s2338_s29 }
 0x8bc   :  { %v1045_v23 = vpop.xlane.xlu0 %1044 }
 0x8bd   :  { %2282 = vrcp.f32 %v1045_v23 }
 0x8c0   :  { %v1048_v24 = vpop.xlane.xlu0 %1047 }
 0x8c1   :  { %2284 = vrcp.f32 %v1048_v24 }
 0x8c4   :  { %v1217_v31 = vpop.permute.xlu0 %1216 }
 0x8c7   :  { %v2283_v26 = vpop.eup %2282 }
 0x8c8   :  { %v1051_v27 = vmul.f32 %v2283_v26, %v2279_v19 }
 0x8ca   :  { %2099 = vmatmul.mubr.msk.f32.vlgmr.msra.gmra.mrb[8].mxu0 %vm194_vm2, %v1051_v27 }
 0x8cb   :  { %v2285_v28 = vpop.eup %2284  ;;  %2107 = vmatpush3.xpose.msk.msra.mxu0 %vm194_vm2, %v1219_v25  ;;  %2108 = vmatprep.mubr.msk.f32.mxu0 %vm2327_vm1, %v2326_v36 }
 0x8cc   :  { %v1052_v30 = vmul.f32 %v2285_v28, %v2281_v21  ;;  %2116 = vmatprep.subr.mxu0 %v2326_v36  ;;  %v1958_v21 = vld [vmem:[%s2724_s6] ss:$0 sm:$0xff] }
 0x8ce   :  { %2104 = vmatmul.mubr.msk.f32.vlgmr.msra.gmra.mrb[14].mxu1 %vm194_vm2, %v1052_v30  ;;  %2109 = vmatmul.mubr.msk.f32.vlgmr.msra.gmra.mrb[10].mxu0 %vm194_vm2, %v1217_v31 }
 0x8cf   :  { %2112 = vmatpush3.xpose.msk.msra.mxu1 %vm194_vm2, %v1297_v29  ;;  %2113 = vmatprep.mubr.msk.f32.mxu1 %vm2327_vm1, %v2326_v36 }
 0x8d0   :  { %2121 = vmatprep.subr.mxu1 %v2326_v36  ;;  %2118 = vmatprep.mubr.msk.f32.mxu0 %vm2327_vm1, %v2326_v36 }
 0x8d2   :  { %2114 = vmatmul.mubr.msk.f32.vlgmr.msra.gmra.mrb[16].mxu1 %vm194_vm2, %v1295_v32 }
 0x8d3   :  { %2123 = vmatprep.mubr.msk.f32.mxu1 %vm2327_vm1, %v2326_v36 }
 0x99d   :  { %v1125_v33 = vpop.f32.mrb[8].mxu0 }
 0x99e   :  { %v2100_v34 = vpop.f32.mrb[9].mxu0 }
 0x9a1   :  { %v1201_v35 = vpop.f32.mrb[14].mxu1  ;;  %v1290_v37 = vpop.f32.mrb[10].mxu0 }
 0x9a2   :  { %v1372_v38 = vmul.f32 0.35355338, %v1290_v37  ;;  %v2105_v40 = vpop.f32.mrb[15].mxu1  ;;  %v2110_v42 = vpop.f32.mrb[11].mxu0 }
 0x9a3   :  { %v1701_v40 = vld [vmem:[%s2727_s9] sm:$0xff]  ;;  %v1702_v42 = vld [vmem:[%s2727_s9 + $0x8] sm:$0xff] }
 0x9a4   :  { %v1374_v43 = vadd.f32 %v1372_v38, %v2480_v49 }
 0x9a5   :  { %v1368_v44 = vpop.f32.mrb[16].mxu1 }
 0x9a6   :  { %v1373_v45 = vmul.f32 0.35355338, %v1368_v44  ;;  %v2115_v46 = vpop.f32.mrb[17].mxu1  ;;  %v1376_v47 = vsel %vm194_vm2, %v1374_v43, -inf  ;;  %v1703_v44 = vld [vmem:[%s2727_s9 + $0x10] sm:$0xff] }
 0x9a7   :  { %1377 = vmax.xlane.f32.xlu0 %v1376_v47  ;;  %v1811_v47 = vld [vmem:[%s2729_s11] sm:$0xff] }
 0x9a8   :  { %v1375_v48 = vadd.f32 %v1373_v45, %v2480_v49  ;;  %v1704_v45 = vld [vmem:[%s2727_s9 + $0x18] sm:$0xff] }
 0x9a9   :  { %v2203_v46 = vpack.c.bf16 %v1704_v45, %v1703_v44 }
 0x9aa   :  { %v1379_v50 = vsel %vm194_vm2, %v1375_v48, -inf }
 0x9ab   :  { %1380 = vmax.xlane.f32.xlu1 %v1379_v50 }
 0x9bc   :  { %1474 = vrot.lane.b32.xlu1 %v2462_v39, %s2339_s30 }
 0x9c0   :  { %862 = vrot.lane.b32.xlu1 %v2544_v59, %s2340_s14 }
 0x9c4   :  { %864 = vrot.lane.b32.xlu1 %v2546_v61, %s2340_s14 }
 0x9c8   :  { %1209 = vrot.lane.b32.xlu1 %v1201_v35, %s2341_s15 }
 0xa34   :  { %v1378_v36 = vpop.xlane.xlu0 %1377 }
 0xa35   :  { %v1382_v51 = vsub.f32 %v1374_v43, %v1378_v36  ;;  %v2199_v43 = vpack.c.bf16 %v1702_v42, %v1701_v40 }
 0xa37   :  { %v1384_v52 = vmul.f32 1.442695, %v1382_v51 }
 0xa38   :  { %v1381_v49 = vpop.xlane.xlu1 %1380 }
 0xa39   :  { %2286 = vpow2.f32 %v1384_v52  ;;  %v1383_v53 = vsub.f32 %v1375_v48, %v1381_v49  ;;  %v1812_v48 = vld [vmem:[%s2729_s11 + $0x8] sm:$0xff] }
 0xa3a   :  { %v2207_v50 = vpack.c.bf16 %v1812_v48, %v1811_v47  ;;  %v1966_v48 = vld [vmem:[%s2730_s12] ss:$0 sm:$0xff] }
 0xa3b   :  { %v1386_v54 = vmul.f32 1.442695, %v1383_v53 }
 0xa3c   :  { %v1475_v55 = vpop.permute.xlu1 %1474 }
 0xa3d   :  { %2288 = vpow2.f32 %v1386_v54  ;;  %2122 = vmatpush3.msra.mxu1 %v1475_v55 }
 0xa40   :  { %v863_v39 = vpop.permute.xlu1 %862 }
 0xa41   :  { %869 = vst.msk [vmem:[#allocation2] sm:$0xff] %vm868_vm4, %v863_v39  ;;  %v1961_v39 = vld [vmem:[%s2725_s7] ss:$0 sm:$0xff] }
 0xa43   :  { %v2287_v56 = vpop.eup %2286 }
 0xa44   :  { %v865_v57 = vpop.permute.xlu1 %864  ;;  %v1388_v58 = vsel %vm194_vm2, %v2287_v56, 0.0 }
 0xa45   :  { %870 = vst.msk [vmem:[#allocation2 + $0x8] sm:$0xff] %vm868_vm4, %v865_v57  ;;  %1389 = vadd.xlane.f32.xlu0 %v1388_v58  ;;  %v1962_v57 = vld [vmem:[%s2726_s8] ss:$0 sm:$0xff]  ;;  %s2343_s8 = smov [#allocation3]  }
 0xa46   :  { %s1918_s21 = sshll.u32 %s2343_s8, 4  ;;  %s1919_s21 = int_to_ptr.vmem [resolvable:$true] %s1918_s21 }
 0xa47   :  { %v2289_v59 = vpop.eup %2288  ;;  %s2302_s1 = scalar_lea.vmem %s1919_s21, 256  ;;  %p2307_p1 = scmp.lt.s32.totalorder %s1919_s21, %s1919_s21 }
 0xa48   :  { %v1210_v60 = vpop.permute.xlu1 %1209  ;;  %v1391_v61 = vsel %vm194_vm2, %v2289_v59, 0.0  ;;  %p2303_p0 = scmp.ne.s32.totalorder %s1919_s21, %s2302_s1  ;;  %p2308_p2 = scmp.lt.s32.totalorder %s2302_s1, %s2302_s1 }
 0xa49   :  { %1215 = vst.msk [vmem:[#allocation2 + $0x8] sm:$0xff] %vm1213_vm5, %v1210_v60  ;;  %1392 = vadd.xlane.f32.xlu0 %v1391_v61 }
 0xa4a   :  { %p2309_p3 = por %p2308_p2, %p2307_p1 }
 0xa4c   :  { %p2310_p4 = pnand %p2309_p3, %p2303_p0 }
 0xa5f   :  { %1398 = vrot.lane.b32.xlu0 %v2464_v41, %s2339_s30  ;;  %v1563_v41 = vld [vmem:[%s2723_s5] sm:$0xff] }
 0xa60   :  { %v2191_v9 = vpack.c.bf16 %v1564_v8, %v1563_v41  ;;  %v1817_v41 = vld [vmem:[%s2729_s11 + $0x30] sm:$0xff]  ;;  %v1818_v8 = vld [vmem:[%s2729_s11 + $0x38] sm:$0xff] }
 0xa62   :  { %2192 = vmatprep.subr.bf16.mxu1 %v2191_v9 }
 0xa63   :  { %1207 = vrot.lane.b32.xlu0 %v1125_v33, %s2341_s15 }
 0xad2   :  { %v1390_v62 = vpop.xlane.xlu0 %1389 }
 0xad3   :  { %2290 = vrcp.f32 %v1390_v62 }
 0xad6   :  { %v1393_v63 = vpop.xlane.xlu0 %1392 }
 0xad7   :  { %2292 = vrcp.f32 %v1393_v63 }
 0xada   :  { %v1399_v2 = vpop.permute.xlu0 %1398 }
 0xadb   :  { %2117 = vmatpush3.msra.mxu0 %v1399_v2  ;;  %v1813_v2 = vld [vmem:[%s2729_s11 + $0x10] sm:$0xff] }
 0xadc   :  { %2208 = vmatprep.subr.bf16.mxu0 %v2207_v50 }
 0xadd   :  { %v2291_v3 = vpop.eup %2290 }
 0xade   :  { %v1396_v4 = vmul.f32 %v2291_v3, %v2287_v56  ;;  %v1208_v5 = vpop.permute.xlu0 %1207  ;;  %v1814_v3 = vld [vmem:[%s2729_s11 + $0x18] sm:$0xff] }
 0xadf   :  { %1214 = vst.msk [vmem:[#allocation2] sm:$0xff] %vm1213_vm5, %v1208_v5  ;;  %v1815_v5 = vld [vmem:[%s2729_s11 + $0x20] sm:$0xff] }
 0xae0   :  { %2119 = vmatmul.mubr.msk.f32.vlgmr.msra.gmra.mrb[12].mxu0 %vm194_vm2, %v1396_v4  ;;  %v2211_v4 = vpack.c.bf16 %v1814_v3, %v1813_v2 }
 0xae1   :  { %v2293_v6 = vpop.eup %2292  ;;  %2210 = vmatpush3.bf16.msra.mxu0 %v2207_v50 }
 0xae2   :  { %v1397_v7 = vmul.f32 %v2293_v6, %v2289_v59  ;;  %2212 = vmatprep.subr.bf16.mxu0 %v2211_v4  ;;  %v1816_v6 = vld [vmem:[%s2729_s11 + $0x28] sm:$0xff] }
 0xae4   :  { %2124 = vmatmul.mubr.msk.f32.vlgmr.msra.gmra.mrb[18].mxu1 %vm194_vm2, %v1397_v7  ;;  %v2215_v7 = vpack.c.bf16 %v1816_v6, %v1815_v5 }
 0xae5   :  { %2194 = vmatpush3.bf16.msra.mxu1 %v2191_v9  ;;  %2214 = vmatpush3.bf16.msra.mxu0 %v2211_v4  ;;  %v2219_v9 = vpack.c.bf16 %v1818_v8, %v1817_v41 }
 0xae6   :  { %2196 = vmatprep.subr.bf16.mxu1 %v2195_v12  ;;  %2216 = vmatprep.subr.bf16.mxu0 %v2215_v7 }
 0xae9   :  { %2198 = vmatpush3.bf16.msra.mxu1 %v2195_v12  ;;  %2218 = vmatpush3.bf16.msra.mxu0 %v2215_v7  ;;  %v2223_v12 = vpack.c.bf16 %v1820_v11, %v1819_v10 }
 0xaea   :  { %2200 = vmatprep.subr.bf16.mxu1 %v2199_v43  ;;  %2220 = vmatprep.subr.bf16.mxu0 %v2219_v9 }
 0xaed   :  { %2222 = vmatpush3.bf16.msra.mxu0 %v2219_v9 }
 0xaee   :  { %2224 = vmatprep.subr.bf16.mxu0 %v2223_v12 }
 0xaf1   :  { %2226 = vmatpush3.bf16.msra.mxu0 %v2223_v12 }
 0xbb3   :  { %v1470_v13 = vpop.f32.mrb[12].mxu0 }
 0xbb4   :  { %1552 = vrot.lane.b32.xlu0 %v1470_v13, %s2342_s2  ;;  %v2120_v14 = vpop.f32.mrb[13].mxu0  ;;  %v1821_v13 = vld [vmem:[%s2729_s11 + $0x50] sm:$0xff] }
 0xbb5   :  { %v1822_v14 = vld [vmem:[%s2729_s11 + $0x58] sm:$0xff] }
 0xbb7   :  { %v1546_v15 = vpop.f32.mrb[18].mxu1 }
 0xbb8   :  { %1554 = vrot.lane.b32.xlu1 %v1546_v15, %s2342_s2  ;;  %v2125_v16 = vpop.f32.mrb[19].mxu1  ;;  %v2227_v15 = vpack.c.bf16 %v1822_v14, %v1821_v13 }
 0xbb9   :  { %v1823_v16 = vld [vmem:[%s2729_s11 + $0x60] sm:$0xff] }
 0xbba   :  { %2228 = vmatprep.subr.bf16.mxu0 %v2227_v15 }
 0xbbb   :  { %2230 = vmatpush3.bf16.msra.mxu0 %v2227_v15 }
 0xc26   :  { %v1553_v17 = vpop.permute.xlu0 %1552 }
 0xc27   :  { %1559 = vst.msk [vmem:[#allocation2] sm:$0xff] %vm1558_vm6, %v1553_v17  ;;  %v1824_v17 = vld [vmem:[%s2729_s11 + $0x68] sm:$0xff] }
 0xc2a   :  { %v1555_v18 = vpop.permute.xlu1 %1554 }
 0xc2b   :  { %1560 = vst.msk [vmem:[#allocation2 + $0x8] sm:$0xff] %vm1558_vm6, %v1555_v18  ;;  %v2231_v18 = vpack.c.bf16 %v1824_v17, %v1823_v16 }
 0xc2d   :  { %2232 = vmatprep.subr.bf16.mxu0 %v2231_v18 }
 0xc2e   :  { %v1561_v19 = vld [vmem:[#allocation2] sm:$0xff]  ;;  %2234 = vmatpush3.bf16.msra.mxu0 %v2231_v18 }
 0xc2f   :  { %2134 = vmatprep.mubr.msk.f32.mxu1 %vm47_vm0, %v1561_v19  ;;  %v1825_v19 = vld [vmem:[%s2729_s11 + $0x70] sm:$0xff] }
 0xc32   :  { %v1562_v20 = vld [vmem:[#allocation2 + $0x8] sm:$0xff] }
 0xc33   :  { %2135 = vmatmul.mubr.msk.f32.vlgmr.msra.gmra.mrb[20].mxu1 %vm47_vm0, %v1562_v20  ;;  %v1826_v20 = vld [vmem:[%s2729_s11 + $0x78] sm:$0xff] }
 0xc34   :  { %2202 = vmatpush3.bf16.msra.mxu1 %v2199_v43 }
 0xc35   :  { %2204 = vmatprep.subr.bf16.mxu1 %v2203_v46 }
 0xc38   :  { %2206 = vmatpush3.bf16.msra.mxu1 %v2203_v46 }
 0xd06   :  { %v2136_v22 = vpop.f32.mrb[20].mxu1 }
 0xd07   :  { %v1652_v23 = vadd.f32 %v2136_v22, %v1958_v21  ;;  %v1646_v24 = vpop.f32.mrb[21].mxu1  ;;  %v1963_v22 = vld [vmem:[%s2728_s10] ss:$0 sm:$0xff] }
 0xd08   :  { %v1647_v25 = vadd.f32 %v1958_v21, %v1646_v24  ;;  %v2235_v21 = vpack.c.bf16 %v1826_v20, %v1825_v19 }
 0xd09   :  { %v2614_v26 = vadd.f32 %v1652_v23, %v2423_v1 }
 0xd0a   :  { %v2617_v27 = vadd.f32 %v1647_v25, %v2418_v0  ;;  %2236 = vmatprep.subr.bf16.mxu0 %v2235_v21 }
 0xd0b   :  { %v1660_v28 = vsel %vm47_vm0, %v2614_v26, 0.0  ;;  %2238 = vmatpush3.bf16.msra.mxu0 %v2235_v21 }
 0xd0c   :  { %1661 = vadd.xlane.f32.xlu1 %v1660_v28  ;;  %v1657_v29 = vsel %vm47_vm0, %v2617_v27, 0.0 }
 0xd0d   :  { %1658 = vadd.xlane.f32.xlu0 %v1657_v29 }
 0xd99   :  { %v1662_v30 = vpop.xlane.xlu1 %1661 }
 0xd9a   :  { %v1664_v31 = vmul.f32 0.03125, %v1662_v30  ;;  %v1659_v32 = vpop.xlane.xlu0 %1658 }
 0xd9b   :  { %v1663_v33 = vmul.f32 0.03125, %v1659_v32 }
 0xd9c   :  { %v1666_v34 = vsub.f32 %v2614_v26, %v1664_v31 }
 0xd9d   :  { %v1665_v1 = vsub.f32 %v2617_v27, %v1663_v33 }
 0xd9e   :  { %v1668_v37 = vmul.f32 %v1666_v34, %v1666_v34 }
 0xd9f   :  { %v1667_v35 = vmul.f32 %v1665_v1, %v1665_v1 }
 0xda0   :  { %v1672_v38 = vsel %vm47_vm0, %v1668_v37, 0.0 }
 0xda1   :  { %v1669_v0 = vsel %vm47_vm0, %v1667_v35, 0.0 }
 0xda2   :  { %1670 = vadd.xlane.f32.xlu0 %v1669_v0 }
 0xda6   :  { %1673 = vadd.xlane.f32.xlu0 %v1672_v38 }
 0xe2f   :  { %v1671_v36 = vpop.xlane.xlu0 %1670 }
 0xe30   :  { %v1675_v51 = vmul.f32 0.03125, %v1671_v36 }
 0xe32   :  { %v1677_v52 = vadd.f32 1e-05, %v1675_v51 }
 0xe33   :  { %v1674_v49 = vpop.xlane.xlu0 %1673 }
 0xe34   :  { %2294 = vrsqrt.f32 %v1677_v52  ;;  %v1676_v53 = vmul.f32 0.03125, %v1674_v49 }
 0xe36   :  { %v1678_v54 = vadd.f32 1e-05, %v1676_v53 }
 0xe38   :  { %2296 = vrsqrt.f32 %v1678_v54 }
 0xe3e   :  { %v2295_v55 = vpop.eup %2294 }
 0xe3f   :  { %v1681_v56 = vmul.f32 %v2295_v55, %v1665_v1 }
 0xe41   :  { %v1690_v58 = vmul.f32 %v1961_v39, %v1681_v56 }
 0xe42   :  { %v2297_v59 = vpop.eup %2296 }
 0xe43   :  { %v1682_v60 = vmul.f32 %v2297_v59, %v1666_v34  ;;  %v1699_v61 = vadd.f32 %v1962_v57, %v1690_v58 }
 0xe45   :  { %v1691_v62 = vmul.f32 %v1961_v39, %v1682_v60  ;;  %2145 = vmatprep.mubr.msk.f32.mxu1 %vm47_vm0, %v1699_v61 }
 0xe47   :  { %v1700_v63 = vadd.f32 %v1962_v57, %v1691_v62 }
 0xe49   :  { %2146 = vmatmul.mubr.msk.f32.vlgmr.msra.gmra.mrb[22].mxu1 %vm47_vm0, %v1700_v63 }
 0xf1c   :  { %v2147_v23 = vpop.f32.mrb[22].mxu1 }
 0xf1d   :  { %v1790_v24 = vadd.f32 %v2147_v23, %v1963_v22  ;;  %v1784_v25 = vpop.f32.mrb[23].mxu1 }
 0xf1e   :  { %v1785_v28 = vadd.f32 %v1963_v22, %v1784_v25 }
 0xf1f   :  { %v1796_v29 = vmul.f32 %v1790_v24, %v1790_v24  ;;  %v1794_v45 = vmul.f32 0.5, %v1790_v24 }
 0xf20   :  { %v1795_v30 = vmul.f32 %v1785_v28, %v1785_v28  ;;  %v1793_v43 = vmul.f32 0.5, %v1785_v28 }
 0xf21   :  { %v1798_v31 = vmul.f32 %v1796_v29, %v1790_v24 }
 0xf22   :  { %v1797_v32 = vmul.f32 %v1795_v30, %v1785_v28 }
 0xf23   :  { %v1800_v33 = vmul.f32 0.044715, %v1798_v31 }
 0xf24   :  { %v1799_v34 = vmul.f32 0.044715, %v1797_v32 }
 0xf25   :  { %v1802_v1 = vadd.f32 %v1800_v33, %v1790_v24 }
 0xf26   :  { %v1801_v35 = vadd.f32 %v1799_v34, %v1785_v28 }
 0xf27   :  { %v1804_v0 = vmul.f32 0.7978846, %v1802_v1 }
 0xf28   :  { %v1803_v37 = vmul.f32 0.7978846, %v1801_v35 }
 0xf29   :  { %2298 = vtanh.f32 %v1804_v0 }
 0xf2a   :  { %2300 = vtanh.f32 %v1803_v37 }
 0xf33   :  { %v2299_v38 = vpop.eup %2298 }
 0xf34   :  { %v2301_v40 = vpop.eup %2300  ;;  %v1808_v42 = vadd.f32 1.0, %v2299_v38 }
 0xf35   :  { %v1807_v44 = vadd.f32 1.0, %v2301_v40 }
 0xf36   :  { %v1810_v47 = vmul.f32 %v1808_v42, %v1794_v45 }
 0xf37   :  { %v1809_v46 = vmul.f32 %v1807_v44, %v1793_v43 }
 0xf39   :  { %2180 = vmatprep.mubr.f32.mxu0 %v1809_v46 }
 0xf3a   :  { %2181 = vmatmul.mubr.f32.vlgmr.msra.gmra.mrb[14].mxu0 %v1810_v47 }
0x100d   :  { %v2182_v50 = vpop.f32.mrb[14].mxu0 }
0x100e   :  { %v1906_v36 = vadd.f32 %v2182_v50, %v1966_v48  ;;  %v1900_v51 = vpop.f32.mrb[15].mxu0 }
0x100f   :  { %v1901_v52 = vadd.f32 %v1966_v48, %v1900_v51 }
0x1010   :  { %v1910_v49 = vadd.f32 %v1906_v36, %v2614_v26 }
0x1011   :  { %v1909_v53 = vadd.f32 %v1901_v52, %v2617_v27 }
0x1012   :  { %1912 = vst.msk [vmem:[#allocation3 + $0x8] sm:$0xff] %vm47_vm0, %v1910_v49 }
0x1013   :  { %1911 = vst.msk [vmem:[#allocation3] sm:$0xff] %vm47_vm0, %v1909_v53 }
0x1014   :  { %2313 = shalt.err (!%p2310_p4)
}
0x1015   :  { %s2314_s5 = scalar_lea.hbm %s2731_s13, 256 }
0x1016   :  { %p2315_p5 = scmp.ne.s32.totalorder %s2731_s13, %s2314_s5  ;;  %p2318_p6 = scmp.lt.u32.totalorder %s2314_s5, %s2731_s13 }
0x1018   :  { %p2320_p7 = pnand %p2318_p6, %p2315_p5 }
0x101a   :  { %2323 = shalt.err (!%p2320_p7)
}
0x101b   :  { %s2344_s24 = smov 128  }
0x101c   :  { %1924 = dma.vmem_to_hbm [thread:$0]  %s1919_s21, 256, %s2731_s13, [#allocation4], %s2344_s24, %s2344_s24, %s2340_s14  }
0x101d   :  { %2324 = dma.done.wait [#allocation4], 256  }
0x101e   :  { %2325 = vsyncadd [#allocation4], 4294967040 }
0x101f   :  { %1928 = vsyncpa [#allocation4], 1 }

</bundles_post_ra>
